<compile_context>
chip_gen: v7x
topology: tpu7x:2x2x1
jax: 0.10.0
libtpu: 0.0.40
codegen_flags: <defaults>
</compile_context>

<pallas_src>
import functools

import jax
import jax.numpy as jnp
import numpy as np
from jax.experimental import pallas as pl
from jax.experimental.pallas import tpu as pltpu

LN_EPS = 1e-5
OUT_LANES = 128  # lane-dense output slab: q1 -> lane 0, q2 -> lane 1


def _round_up(x, m):
    return ((x + m - 1) // m) * m


def _vmem_limit_bytes():
    """Generation-aware scoped-VMEM limit (~85% of physical)."""
    cap = 64 * 1024 * 1024
    try:
        info = pltpu.get_tpu_info()
        cap = int(getattr(info, "vmem_capacity_bytes", cap))
    except Exception:
        pass
    return max(32 * 1024 * 1024, int(cap * 0.85))


# ----------------------------------------------------------------------------
# Kernel
# ----------------------------------------------------------------------------
def _critic_kernel(obs_ref, act_ref, w_tr_ref, tvec_ref,
                   wa_h_ref, wa_act_ref, ba_ref,
                   wb_ref, bb_ref, wc_ref, bc_ref,
                   out_ref, h_acc,
                   *, repr_dim, feature_dim, hidden_pad, k_tile, compute_dtype):
    f32 = jnp.float32
    k = pl.program_id(1)

    @pl.when(k == 0)
    def _():
        h_acc[...] = jnp.zeros_like(h_acc)

    # ---- trunk Linear, K-blocked: h += obs[:, kTK:(k+1)TK] @ W_tr[k] -------
    obs_blk = obs_ref[...]
    if repr_dim % k_tile != 0:
        # The last K block reaches past obs's real columns; the out-of-bounds
        # part of the VMEM buffer is stale garbage (possibly NaN/Inf), so zero
        # it explicitly instead of relying on the zero-padded weight rows.
        col = k * k_tile + jax.lax.broadcasted_iota(jnp.int32, obs_blk.shape, 1)
        obs_blk = jnp.where(col < repr_dim, obs_blk, jnp.zeros_like(obs_blk))
    h_acc[...] += jnp.dot(obs_blk.astype(compute_dtype), w_tr_ref[...],
                          preferred_element_type=f32)

    @pl.when(k == pl.num_programs(1) - 1)
    def _():
        # ---- trunk bias + LayerNorm (two-pass variance) + tanh -------------
        h = h_acc[...] + tvec_ref[0:1, :]       # padded lanes stay exactly 0
        inv_f = 1.0 / feature_dim
        mean = jnp.sum(h, axis=-1, keepdims=True) * inv_f
        d = h - mean
        if h.shape[-1] != feature_dim:
            # Padded feature lanes must not contribute to the variance sum.
            lane = jax.lax.broadcasted_iota(jnp.int32, d.shape, 1)
            dm = jnp.where(lane < feature_dim, d, 0.0)
        else:
            dm = d
        var = jnp.sum(dm * dm, axis=-1, keepdims=True) * inv_f
        h = d * jax.lax.rsqrt(var + LN_EPS)
        h = h * tvec_ref[1:2, :] + tvec_ref[2:3, :]  # gamma=0 in padded lanes
        h = jnp.tanh(h)

        # ---- Q1/Q2 layer 1: fused heads + split weights (no concat) --------
        act = act_ref[...].astype(compute_dtype)
        xa = (jnp.dot(h.astype(compute_dtype), wa_h_ref[...],
                      preferred_element_type=f32)
              + jnp.dot(act, wa_act_ref[...], preferred_element_type=f32)
              + ba_ref[...])
        xa = jnp.maximum(xa, 0.0)               # [TB, 2*H_pad]
        x1 = xa[:, :hidden_pad]                 # lane-aligned static slices
        x2 = xa[:, hidden_pad:]

        # ---- Q1/Q2 layer 2 --------------------------------------------------
        x1 = jnp.maximum(
            jnp.dot(x1.astype(compute_dtype), wb_ref[0],
                    preferred_element_type=f32) + bb_ref[:, :hidden_pad], 0.0)
        x2 = jnp.maximum(
            jnp.dot(x2.astype(compute_dtype), wb_ref[1],
                    preferred_element_type=f32) + bb_ref[:, hidden_pad:], 0.0)

        # ---- Q1/Q2 layer 3: both scalar heads into one lane-dense slab -----
        q = (jnp.dot(x1.astype(compute_dtype), wc_ref[0],
                     preferred_element_type=f32)
             + jnp.dot(x2.astype(compute_dtype), wc_ref[1],
                       preferred_element_type=f32)
             + bc_ref[...])
        out_ref[...] = q                        # [TB, 128] f32, unmasked store


# ----------------------------------------------------------------------------
# Parameter init (canonical f32, PyTorch-like layout: y = x @ W + b)
# ----------------------------------------------------------------------------
def init_params(key, repr_dim, action_dim, feature_dim, hidden_dim):
    ks = jax.random.split(key, 8)

    def lin(k, fan_in, fan_out):
        w = jax.random.normal(k, (fan_in, fan_out), jnp.float32) / np.sqrt(fan_in)
        b = jnp.zeros((1, fan_out), jnp.float32)
        return w, b

    w_tr, b_tr = lin(ks[0], repr_dim, feature_dim)
    in_q = feature_dim + action_dim
    w1a, b1a = lin(ks[1], in_q, hidden_dim)
    w1b, b1b = lin(ks[2], hidden_dim, hidden_dim)
    w1c, b1c = lin(ks[3], hidden_dim, 1)
    w2a, b2a = lin(ks[4], in_q, hidden_dim)
    w2b, b2b = lin(ks[5], hidden_dim, hidden_dim)
    w2c, b2c = lin(ks[6], hidden_dim, 1)
    return dict(
        w_tr=w_tr, b_tr=b_tr,
        ln_g=jnp.ones((1, feature_dim), jnp.float32),
        ln_b=jnp.zeros((1, feature_dim), jnp.float32),
        w1a=w1a, b1a=b1a, w1b=w1b, b1b=b1b, w1c=w1c, b1c=b1c,
        w2a=w2a, b2a=b2a, w2b=w2b, b2b=b2b, w2c=w2c, b2c=b2c,
    )


# ----------------------------------------------------------------------------
# Pack / pad params into the lane-dense, fused layout consumed by the kernel.
# Done once at (re)load time, so none of this padding shows up in the per-step
# HBM traffic (obs / action are streamed unpadded).
# ----------------------------------------------------------------------------
def pack_params(params, repr_dim, action_dim, feature_dim, hidden_dim,
                compute_dtype=jnp.bfloat16, k_tile=4096):
    assert k_tile % 128 == 0
    if repr_dim <= k_tile:
        tk, r_pad = repr_dim, repr_dim          # single K step, no row padding
    else:
        tk = k_tile
        r_pad = _round_up(repr_dim, tk)
    n_k = r_pad // tk

    F_pad = _round_up(feature_dim, 128)
    H_pad = _round_up(hidden_dim, 128)

    # trunk weight (rows zero-padded to the K-tile grid) + packed (b, g, beta)
    w_tr = jnp.zeros((r_pad, F_pad), compute_dtype)
    w_tr = w_tr.at[:repr_dim, :feature_dim].set(
        params["w_tr"].astype(compute_dtype))
    tvec = jnp.zeros((3, F_pad), jnp.float32)
    tvec = tvec.at[0, :feature_dim].set(params["b_tr"][0])
    tvec = tvec.at[1, :feature_dim].set(params["ln_g"][0])
    tvec = tvec.at[2, :feature_dim].set(params["ln_b"][0])

    # fused Q1||Q2 first layer, split into h-part and action-part (no concat)
    wa_h = jnp.zeros((F_pad, 2 * H_pad), compute_dtype)
    wa_h = wa_h.at[:feature_dim, :hidden_dim].set(
        params["w1a"][:feature_dim].astype(compute_dtype))
    wa_h = wa_h.at[:feature_dim, H_pad:H_pad + hidden_dim].set(
        params["w2a"][:feature_dim].astype(compute_dtype))
    wa_act = jnp.zeros((action_dim, 2 * H_pad), compute_dtype)
    wa_act = wa_act.at[:, :hidden_dim].set(
        params["w1a"][feature_dim:].astype(compute_dtype))
    wa_act = wa_act.at[:, H_pad:H_pad + hidden_dim].set(
        params["w2a"][feature_dim:].astype(compute_dtype))
    ba = jnp.zeros((1, 2 * H_pad), jnp.float32)
    ba = ba.at[0, :hidden_dim].set(params["b1a"][0])
    ba = ba.at[0, H_pad:H_pad + hidden_dim].set(params["b2a"][0])

    # second hidden layer (packed along a leading axis of 2)
    wb = jnp.zeros((2, H_pad, H_pad), compute_dtype)
    wb = wb.at[0, :hidden_dim, :hidden_dim].set(params["w1b"].astype(compute_dtype))
    wb = wb.at[1, :hidden_dim, :hidden_dim].set(params["w2b"].astype(compute_dtype))
    bb = jnp.zeros((1, 2 * H_pad), jnp.float32)
    bb = bb.at[0, :hidden_dim].set(params["b1b"][0])
    bb = bb.at[0, H_pad:H_pad + hidden_dim].set(params["b2b"][0])

    # final layer: both scalar heads mapped into a 128-lane output slab
    wc = jnp.zeros((2, H_pad, OUT_LANES), compute_dtype)
    wc = wc.at[0, :hidden_dim, 0].set(params["w1c"][:, 0].astype(compute_dtype))
    wc = wc.at[1, :hidden_dim, 1].set(params["w2c"][:, 0].astype(compute_dtype))
    bc = jnp.zeros((1, OUT_LANES), jnp.float32)
    bc = bc.at[0, 0].set(params["b1c"][0, 0])
    bc = bc.at[0, 1].set(params["b2c"][0, 0])

    return dict(
        w_tr=w_tr, tvec=tvec, wa_h=wa_h, wa_act=wa_act, ba=ba,
        wb=wb, bb=bb, wc=wc, bc=bc,
        dims=dict(repr_dim=repr_dim, action_dim=action_dim,
                  feature_dim=feature_dim, hidden_dim=hidden_dim,
                  F_pad=F_pad, H_pad=H_pad, k_tile=tk, n_k=n_k),
    )


# ----------------------------------------------------------------------------
# Wrapper
# ----------------------------------------------------------------------------
def critic_forward(obs, action, packed, *, block_b=128):
    d = packed["dims"]
    compute_dtype = packed["w_tr"].dtype
    B = obs.shape[0]
    A = action.shape[1]
    TB = max(8, min(block_b, _round_up(B, 8)))
    nb = pl.cdiv(B, TB)
    TK, nk = d["k_tile"], d["n_k"]
    F_pad, H_pad = d["F_pad"], d["H_pad"]

    resident = (packed["tvec"], packed["wa_h"], packed["wa_act"], packed["ba"],
                packed["wb"], packed["bb"], packed["wc"], packed["bc"])
    weight_bytes = sum(int(np.prod(a.shape)) * a.dtype.itemsize
                       for a in (packed["w_tr"],) + resident)

    # Advisory cost hint for XLA's scheduler (memory-bound custom call).
    flops = (2 * B * d["repr_dim"] * d["feature_dim"]
             + 2 * B * (d["feature_dim"] + d["action_dim"]) * 2 * d["hidden_dim"]
             + 4 * B * d["hidden_dim"] * d["hidden_dim"]
             + 4 * B * d["hidden_dim"] * OUT_LANES)
    bytes_accessed = (obs.size * obs.dtype.itemsize
                      + action.size * action.dtype.itemsize
                      + weight_bytes + B * OUT_LANES * 4)
    cost = pl.CostEstimate(flops=flops,
                           transcendentals=B * d["feature_dim"],
                           bytes_accessed=bytes_accessed)

    kernel = functools.partial(
        _critic_kernel,
        repr_dim=d["repr_dim"], feature_dim=d["feature_dim"],
        hidden_pad=H_pad, k_tile=TK, compute_dtype=compute_dtype)

    def _run(resident_mode):
        def _resident_spec(arr):
            zeros = (0,) * arr.ndim
            if resident_mode is None:
                return pl.BlockSpec(arr.shape, lambda i, k, _z=zeros: _z)
            return pl.BlockSpec(arr.shape, lambda i, k, _z=zeros: _z,
                                pipeline_mode=resident_mode)

        in_specs = (
            [pl.BlockSpec((TB, TK), lambda i, k: (i, k)),     # obs (streamed)
             pl.BlockSpec((TB, A), lambda i, k: (i, 0)),      # action
             pl.BlockSpec((TK, F_pad), lambda i, k: (k, 0))]  # trunk weight
            + [_resident_spec(a) for a in resident])

        return pl.pallas_call(
            kernel,
            out_shape=jax.ShapeDtypeStruct((B, OUT_LANES), jnp.float32),
            grid=(nb, nk),
            in_specs=in_specs,
            out_specs=pl.BlockSpec((TB, OUT_LANES), lambda i, k: (i, 0)),
            scratch_shapes=[pltpu.VMEM((TB, F_pad), jnp.float32)],
            compiler_params=pltpu.CompilerParams(
                dimension_semantics=("parallel", "arbitrary"),
                vmem_limit_bytes=_vmem_limit_bytes()),
            cost_estimate=cost,
        )(obs, action, packed["w_tr"], *resident)

    try:
        out = _run(pl.Buffered(1))   # single-buffer the resident weights
    except Exception:                 # fallback if Buffered(1) is unsupported
        out = _run(None)

    return out[:, 0:1], out[:, 1:2]


# ----------------------------------------------------------------------------
# Pure-JAX f32 reference mirroring the PyTorch forward
# ----------------------------------------------------------------------------
def critic_reference(obs, action, p):
    h = obs @ p["w_tr"] + p["b_tr"]
    mean = jnp.mean(h, axis=-1, keepdims=True)
    var = jnp.mean((h - mean) ** 2, axis=-1, keepdims=True)
    h = (h - mean) / jnp.sqrt(var + LN_EPS) * p["ln_g"] + p["ln_b"]
    h = jnp.tanh(h)
    ha = jnp.concatenate([h, action], axis=-1)

    def mlp(x, a, ab, b, bb, c, cb):
        x = jax.nn.relu(x @ a + ab)
        x = jax.nn.relu(x @ b + bb)
        return x @ c + cb

    q1 = mlp(ha, p["w1a"], p["b1a"], p["w1b"], p["b1b"], p["w1c"], p["b1c"])
    q2 = mlp(ha, p["w2a"], p["b2a"], p["w2b"], p["b2b"], p["w2c"], p["b2c"])
    return q1, q2


if __name__ == "__main__":
    key = jax.random.PRNGKey(0)

    # --- test 1: small shapes, f32 compute path, single K step --------------
    B, repr_dim, action_dim, feature_dim, hidden_dim = 8, 64, 4, 32, 32
    k_obs, k_act, k_par, key = jax.random.split(key, 4)
    obs = jax.random.normal(k_obs, (B, repr_dim), jnp.float32)
    action = jax.random.uniform(k_act, (B, action_dim), jnp.float32,
                                minval=-1.0, maxval=1.0)
    params = init_params(k_par, repr_dim, action_dim, feature_dim, hidden_dim)
    packed = pack_params(params, repr_dim, action_dim, feature_dim, hidden_dim,
                         compute_dtype=jnp.float32)
    q1, q2 = critic_forward(obs, action, packed)
    jax.block_until_ready((q1, q2))
    q1_ref, q2_ref = critic_reference(obs, action, params)
    np.testing.assert_allclose(np.asarray(q1), np.asarray(q1_ref),
                               rtol=2e-2, atol=2e-2)
    np.testing.assert_allclose(np.asarray(q2), np.asarray(q2_ref),
                               rtol=2e-2, atol=2e-2)

    # --- test 2: production path — bf16 MXU operands, multi-step K reduction,
    #             ragged batch tile and ragged K tail ------------------------
    B, repr_dim, action_dim, feature_dim, hidden_dim = 12, 200, 6, 48, 40
    k_obs, k_act, k_par, key = jax.random.split(key, 4)
    obs = jax.random.normal(k_obs, (B, repr_dim), jnp.float32)
    action = jax.random.uniform(k_act, (B, action_dim), jnp.float32,
                                minval=-1.0, maxval=1.0)
    params = init_params(k_par, repr_dim, action_dim, feature_dim, hidden_dim)
    packed = pack_params(params, repr_dim, action_dim, feature_dim, hidden_dim,
                         compute_dtype=jnp.bfloat16, k_tile=128)
    q1, q2 = critic_forward(obs, action, packed, block_b=8)
    jax.block_until_ready((q1, q2))
    q1_ref, q2_ref = critic_reference(obs, action, params)
    np.testing.assert_allclose(np.asarray(q1), np.asarray(q1_ref),
                               rtol=5e-2, atol=5e-2)
    np.testing.assert_allclose(np.asarray(q2), np.asarray(q2_ref),
                               rtol=5e-2, atol=5e-2)

    print("KERNEL_OK")
</pallas_src>

<mosaic_0001>
module attributes {stable_mosaic.version = 11 : i64} {
  func.func @_critic_kernel(%arg0: i32, %arg1: i32, %arg2: memref<8x64xf32, #tpu.memory_space<vmem>>, %arg3: memref<8x4xf32, #tpu.memory_space<vmem>>, %arg4: memref<64x128xf32, #tpu.memory_space<vmem>>, %arg5: memref<3x128xf32, #tpu.memory_space<vmem>>, %arg6: memref<128x256xf32, #tpu.memory_space<vmem>>, %arg7: memref<4x256xf32, #tpu.memory_space<vmem>>, %arg8: memref<1x256xf32, #tpu.memory_space<vmem>>, %arg9: memref<2x128x128xf32, #tpu.memory_space<vmem>>, %arg10: memref<1x256xf32, #tpu.memory_space<vmem>>, %arg11: memref<2x128x128xf32, #tpu.memory_space<vmem>>, %arg12: memref<1x128xf32, #tpu.memory_space<vmem>>, %arg13: memref<8x128xf32, #tpu.memory_space<vmem>>, %arg14: memref<8x128xf32, #tpu.memory_space<vmem>>) attributes {dimension_semantics = [#tpu.dimension_semantics<parallel>, #tpu.dimension_semantics<arbitrary>], iteration_bounds = array<i64: 1, 1>, scalar_prefetch = 0 : i64, scratch_operands = 1 : i64, tpu.core_type = #tpu.core_type<tc>, window_params = [{transform_indices = @transform_0, window_bounds = array<i64: 8, 64>}, {transform_indices = @transform_1, window_bounds = array<i64: 8, 4>}, {transform_indices = @transform_2, window_bounds = array<i64: 64, 128>}, {pipeline_mode = #tpu.pipeline_mode<synchronous>, transform_indices = @transform_3, window_bounds = array<i64: 3, 128>}, {pipeline_mode = #tpu.pipeline_mode<synchronous>, transform_indices = @transform_4, window_bounds = array<i64: 128, 256>}, {pipeline_mode = #tpu.pipeline_mode<synchronous>, transform_indices = @transform_5, window_bounds = array<i64: 4, 256>}, {pipeline_mode = #tpu.pipeline_mode<synchronous>, transform_indices = @transform_6, window_bounds = array<i64: 1, 256>}, {pipeline_mode = #tpu.pipeline_mode<synchronous>, transform_indices = @transform_7, window_bounds = array<i64: 2, 128, 128>}, {pipeline_mode = #tpu.pipeline_mode<synchronous>, transform_indices = @transform_8, window_bounds = array<i64: 1, 256>}, {pipeline_mode = #tpu.pipeline_mode<synchronous>, transform_indices = @transform_9, window_bounds = array<i64: 2, 128, 128>}, {pipeline_mode = #tpu.pipeline_mode<synchronous>, transform_indices = @transform_10, window_bounds = array<i64: 1, 128>}, {transform_indices = @transform_11, window_bounds = array<i64: 8, 128>}]} {
    %c0_i32 = arith.constant 0 : i32
    %0 = arith.cmpi eq, %arg1, %c0_i32 : i32
    %1 = arith.extui %0 : i1 to i32
    %c0_i32_0 = arith.constant 0 : i32
    %2 = arith.cmpi ne, %1, %c0_i32_0 : i32
    scf.if %2 {
      %cst_10 = arith.constant 0.000000e+00 : f32
      %12 = vector.broadcast %cst_10 : f32 to vector<8x128xf32>
      %c0_11 = arith.constant 0 : index
      %c0_12 = arith.constant 0 : index
      %13 = vector.load %arg14[%c0_11, %c0_12] : memref<8x128xf32, #tpu.memory_space<vmem>>, vector<8x128xf32>
      tpu.vector_store %arg14[%c0_11, %c0_12], %12 {strides = array<i32>} : memref<8x128xf32, #tpu.memory_space<vmem>>, vector<8x128xf32>,
    } else {
    }
    %c0 = arith.constant 0 : index
    %c0_1 = arith.constant 0 : index
    %3 = vector.load %arg2[%c0, %c0_1] : memref<8x64xf32, #tpu.memory_space<vmem>>, vector<8x64xf32>
    %c0_2 = arith.constant 0 : index
    %c0_3 = arith.constant 0 : index
    %4 = vector.load %arg14[%c0_2, %c0_3] : memref<8x128xf32, #tpu.memory_space<vmem>>, vector<8x128xf32>
    %c0_4 = arith.constant 0 : index
    %c0_5 = arith.constant 0 : index
    %5 = vector.load %arg4[%c0_4, %c0_5] : memref<64x128xf32, #tpu.memory_space<vmem>>, vector<64x128xf32>
    %cst = arith.constant dense<0.000000e+00> : vector<8x128xf32>
    %6 = tpu.matmul %3, %5, %cst {dimension_numbers = #tpu.dot_dimension_numbers<[1], [0], [0], [1], [0, 0, 1, 1], [], []>} : vector<8x64xf32>, vector<64x128xf32>, vector<8x128xf32> -> vector<8x128xf32>
    %7 = arith.addf %4, %6 : vector<8x128xf32>
    %c0_6 = arith.constant 0 : index
    %c0_7 = arith.constant 0 : index
    %8 = vector.load %arg14[%c0_6, %c0_7] : memref<8x128xf32, #tpu.memory_space<vmem>>, vector<8x128xf32>
    tpu.vector_store %arg14[%c0_6, %c0_7], %7 {strides = array<i32>} : memref<8x128xf32, #tpu.memory_space<vmem>>, vector<8x128xf32>,
    %c0_i32_8 = arith.constant 0 : i32
    %9 = arith.cmpi eq, %arg1, %c0_i32_8 : i32
    %10 = arith.extui %9 : i1 to i32
    %c0_i32_9 = arith.constant 0 : i32
    %11 = arith.cmpi ne, %10, %c0_i32_9 : i32
    scf.if %11 {
      %c0_10 = arith.constant 0 : index
      %c0_11 = arith.constant 0 : index
      %12 = vector.load %arg14[%c0_10, %c0_11] : memref<8x128xf32, #tpu.memory_space<vmem>>, vector<8x128xf32>
      %c0_12 = arith.constant 0 : index
      %c0_13 = arith.constant 0 : index
      %13 = vector.load %arg5[%c0_12, %c0_13] : memref<3x128xf32, #tpu.memory_space<vmem>>, vector<1x128xf32>
      %14 = vector.broadcast %13 : vector<1x128xf32> to vector<8x128xf32>
      %15 = arith.addf %12, %14 : vector<8x128xf32>
      %cst_14 = arith.constant dense<0.000000e+00> : vector<8xf32>
      %16 = vector.multi_reduction <add>, %15, %cst_14 [1] : vector<8x128xf32> to vector<8xf32>
      %17 = vector.shape_cast %16 : vector<8xf32> to vector<8x1xf32>
      %cst_15 = arith.constant 3.125000e-02 : f32
      %18 = vector.broadcast %cst_15 : f32 to vector<8x1xf32>
      %19 = arith.mulf %17, %18 : vector<8x1xf32>
      %20 = vector.broadcast %19 : vector<8x1xf32> to vector<8x128xf32>
      %21 = arith.subf %15, %20 : vector<8x128xf32>
      %22 = tpu.iota {dimensions = array<i32: 1>} : vector<8x128xi32>
      %c32_i32 = arith.constant 32 : i32
      %23 = vector.broadcast %c32_i32 : i32 to vector<8x128xi32>
      %24 = arith.cmpi slt, %22, %23 : vector<8x128xi32>
      %cst_16 = arith.constant 0.000000e+00 : f32
      %25 = vector.broadcast %cst_16 : f32 to vector<8x128xf32>
      %26 = arith.select %24, %21, %25 : vector<8x128xi1>, vector<8x128xf32>
      %27 = arith.mulf %26, %26 : vector<8x128xf32>
      %cst_17 = arith.constant dense<0.000000e+00> : vector<8xf32>
      %28 = vector.multi_reduction <add>, %27, %cst_17 [1] : vector<8x128xf32> to vector<8xf32>
      %29 = vector.shape_cast %28 : vector<8xf32> to vector<8x1xf32>
      %cst_18 = arith.constant 3.125000e-02 : f32
      %30 = vector.broadcast %cst_18 : f32 to vector<8x1xf32>
      %31 = arith.mulf %29, %30 : vector<8x1xf32>
      %cst_19 = arith.constant 9.99999974E-6 : f32
      %32 = vector.broadcast %cst_19 : f32 to vector<8x1xf32>
      %33 = arith.addf %31, %32 : vector<8x1xf32>
      %34 = math.rsqrt %33 : vector<8x1xf32>
      %35 = vector.broadcast %34 : vector<8x1xf32> to vector<8x128xf32>
      %36 = arith.mulf %21, %35 : vector<8x128xf32>
      %c1 = arith.constant 1 : index
      %c0_20 = arith.constant 0 : index
      %37 = vector.load %arg5[%c1, %c0_20] : memref<3x128xf32, #tpu.memory_space<vmem>>, vector<1x128xf32>
      %38 = vector.broadcast %37 : vector<1x128xf32> to vector<8x128xf32>
      %39 = arith.mulf %36, %38 : vector<8x128xf32>
      %c2 = arith.constant 2 : index
      %c0_21 = arith.constant 0 : index
      %40 = vector.load %arg5[%c2, %c0_21] : memref<3x128xf32, #tpu.memory_space<vmem>>, vector<1x128xf32>
      %41 = vector.broadcast %40 : vector<1x128xf32> to vector<8x128xf32>
      %42 = arith.addf %39, %41 : vector<8x128xf32>
      %43 = math.tanh %42 : vector<8x128xf32>
      %c0_22 = arith.constant 0 : index
      %c0_23 = arith.constant 0 : index
      %44 = vector.load %arg3[%c0_22, %c0_23] : memref<8x4xf32, #tpu.memory_space<vmem>>, vector<8x4xf32>
      %c0_24 = arith.constant 0 : index
      %c0_25 = arith.constant 0 : index
      %45 = vector.load %arg6[%c0_24, %c0_25] : memref<128x256xf32, #tpu.memory_space<vmem>>, vector<128x256xf32>
      %cst_26 = arith.constant dense<0.000000e+00> : vector<8x256xf32>
      %46 = tpu.matmul %43, %45, %cst_26 {dimension_numbers = #tpu.dot_dimension_numbers<[1], [0], [0], [1], [0, 0, 1, 1], [], []>} : vector<8x128xf32>, vector<128x256xf32>, vector<8x256xf32> -> vector<8x256xf32>
      %c0_27 = arith.constant 0 : index
      %c0_28 = arith.constant 0 : index
      %47 = vector.load %arg7[%c0_27, %c0_28] : memref<4x256xf32, #tpu.memory_space<vmem>>, vector<4x256xf32>
      %cst_29 = arith.constant dense<0.000000e+00> : vector<8x256xf32>
      %48 = tpu.matmul %44, %47, %cst_29 {dimension_numbers = #tpu.dot_dimension_numbers<[1], [0], [0], [1], [0, 0, 1, 1], [], []>} : vector<8x4xf32>, vector<4x256xf32>, vector<8x256xf32> -> vector<8x256xf32>
      %49 = arith.addf %46, %48 : vector<8x256xf32>
      %c0_30 = arith.constant 0 : index
      %c0_31 = arith.constant 0 : index
      %50 = vector.load %arg8[%c0_30, %c0_31] : memref<1x256xf32, #tpu.memory_space<vmem>>, vector<1x256xf32>
      %51 = vector.broadcast %50 : vector<1x256xf32> to vector<8x256xf32>
      %52 = arith.addf %49, %51 : vector<8x256xf32>
      %cst_32 = arith.constant 0.000000e+00 : f32
      %53 = vector.broadcast %cst_32 : f32 to vector<8x256xf32>
      %54 = arith.maximumf %52, %53 : vector<8x256xf32>
      %55 = vector.extract_strided_slice %54 {offsets = [0, 0], sizes = [8, 128], strides = [1, 1]} : vector<8x256xf32> to vector<8x128xf32>
      %56 = vector.extract_strided_slice %54 {offsets = [0, 128], sizes = [8, 128], strides = [1, 1]} : vector<8x256xf32> to vector<8x128xf32>
      %c0_33 = arith.constant 0 : index
      %c0_34 = arith.constant 0 : index
      %c0_35 = arith.constant 0 : index
      %57 = vector.load %arg9[%c0_33, %c0_34, %c0_35] : memref<2x128x128xf32, #tpu.memory_space<vmem>>, vector<1x128x128xf32>
      %58 = vector.shape_cast %57 : vector<1x128x128xf32> to vector<128x128xf32>
      %cst_36 = arith.constant dense<0.000000e+00> : vector<8x128xf32>
      %59 = tpu.matmul %55, %58, %cst_36 {dimension_numbers = #tpu.dot_dimension_numbers<[1], [0], [0], [1], [0, 0, 1, 1], [], []>} : vector<8x128xf32>, vector<128x128xf32>, vector<8x128xf32> -> vector<8x128xf32>
      %c0_37 = arith.constant 0 : index
      %c0_38 = arith.constant 0 : index
      %60 = vector.load %arg10[%c0_37, %c0_38] : memref<1x256xf32, #tpu.memory_space<vmem>>, vector<1x128xf32>
      %61 = vector.broadcast %60 : vector<1x128xf32> to vector<8x128xf32>
      %62 = arith.addf %59, %61 : vector<8x128xf32>
      %cst_39 = arith.constant 0.000000e+00 : f32
      %63 = vector.broadcast %cst_39 : f32 to vector<8x128xf32>
      %64 = arith.maximumf %62, %63 : vector<8x128xf32>
      %c1_40 = arith.constant 1 : index
      %c0_41 = arith.constant 0 : index
      %c0_42 = arith.constant 0 : index
      %65 = vector.load %arg9[%c1_40, %c0_41, %c0_42] : memref<2x128x128xf32, #tpu.memory_space<vmem>>, vector<1x128x128xf32>
      %66 = vector.shape_cast %65 : vector<1x128x128xf32> to vector<128x128xf32>
      %cst_43 = arith.constant dense<0.000000e+00> : vector<8x128xf32>
      %67 = tpu.matmul %56, %66, %cst_43 {dimension_numbers = #tpu.dot_dimension_numbers<[1], [0], [0], [1], [0, 0, 1, 1], [], []>} : vector<8x128xf32>, vector<128x128xf32>, vector<8x128xf32> -> vector<8x128xf32>
      %c0_44 = arith.constant 0 : index
      %c128 = arith.constant 128 : index
      %68 = vector.load %arg10[%c0_44, %c128] : memref<1x256xf32, #tpu.memory_space<vmem>>, vector<1x128xf32>
      %69 = vector.broadcast %68 : vector<1x128xf32> to vector<8x128xf32>
      %70 = arith.addf %67, %69 : vector<8x128xf32>
      %cst_45 = arith.constant 0.000000e+00 : f32
      %71 = vector.broadcast %cst_45 : f32 to vector<8x128xf32>
      %72 = arith.maximumf %70, %71 : vector<8x128xf32>
      %c0_46 = arith.constant 0 : index
      %c0_47 = arith.constant 0 : index
      %c0_48 = arith.constant 0 : index
      %73 = vector.load %arg11[%c0_46, %c0_47, %c0_48] : memref<2x128x128xf32, #tpu.memory_space<vmem>>, vector<1x128x128xf32>
      %74 = vector.shape_cast %73 : vector<1x128x128xf32> to vector<128x128xf32>
      %cst_49 = arith.constant dense<0.000000e+00> : vector<8x128xf32>
      %75 = tpu.matmul %64, %74, %cst_49 {dimension_numbers = #tpu.dot_dimension_numbers<[1], [0], [0], [1], [0, 0, 1, 1], [], []>} : vector<8x128xf32>, vector<128x128xf32>, vector<8x128xf32> -> vector<8x128xf32>
      %c1_50 = arith.constant 1 : index
      %c0_51 = arith.constant 0 : index
      %c0_52 = arith.constant 0 : index
      %76 = vector.load %arg11[%c1_50, %c0_51, %c0_52] : memref<2x128x128xf32, #tpu.memory_space<vmem>>, vector<1x128x128xf32>
      %77 = vector.shape_cast %76 : vector<1x128x128xf32> to vector<128x128xf32>
      %cst_53 = arith.constant dense<0.000000e+00> : vector<8x128xf32>
      %78 = tpu.matmul %72, %77, %cst_53 {dimension_numbers = #tpu.dot_dimension_numbers<[1], [0], [0], [1], [0, 0, 1, 1], [], []>} : vector<8x128xf32>, vector<128x128xf32>, vector<8x128xf32> -> vector<8x128xf32>
      %79 = arith.addf %75, %78 : vector<8x128xf32>
      %c0_54 = arith.constant 0 : index
      %c0_55 = arith.constant 0 : index
      %80 = vector.load %arg12[%c0_54, %c0_55] : memref<1x128xf32, #tpu.memory_space<vmem>>, vector<1x128xf32>
      %81 = vector.broadcast %80 : vector<1x128xf32> to vector<8x128xf32>
      %82 = arith.addf %79, %81 : vector<8x128xf32>
      %c0_56 = arith.constant 0 : index
      %c0_57 = arith.constant 0 : index
      %83 = vector.load %arg13[%c0_56, %c0_57] : memref<8x128xf32, #tpu.memory_space<vmem>>, vector<8x128xf32>
      tpu.vector_store %arg13[%c0_56, %c0_57], %82 {strides = array<i32>} : memref<8x128xf32, #tpu.memory_space<vmem>>, vector<8x128xf32>,
    } else {
    }
    return
  }
  func.func @transform_0(%arg0: i32, %arg1: i32) -> (i32, i32) {
    %c0_i32 = arith.constant 0 : i32
    return %arg0, %arg1 : i32, i32
  }
  func.func @transform_1(%arg0: i32, %arg1: i32) -> (i32, i32) {
    %c0_i32 = arith.constant 0 : i32
    %c0_i32_0 = arith.constant 0 : i32
    return %arg0, %c0_i32 : i32, i32
  }
  func.func @transform_2(%arg0: i32, %arg1: i32) -> (i32, i32) {
    %c0_i32 = arith.constant 0 : i32
    %c0_i32_0 = arith.constant 0 : i32
    return %arg1, %c0_i32 : i32, i32
  }
  func.func @transform_3(%arg0: i32, %arg1: i32) -> (i32, i32) {
    %c0_i32 = arith.constant 0 : i32
    %c0_i32_0 = arith.constant 0 : i32
    %c0_i32_1 = arith.constant 0 : i32
    return %c0_i32, %c0_i32_0 : i32, i32
  }
  func.func @transform_4(%arg0: i32, %arg1: i32) -> (i32, i32) {
    %c0_i32 = arith.constant 0 : i32
    %c0_i32_0 = arith.constant 0 : i32
    %c0_i32_1 = arith.constant 0 : i32
    return %c0_i32, %c0_i32_0 : i32, i32
  }
  func.func @transform_5(%arg0: i32, %arg1: i32) -> (i32, i32) {
    %c0_i32 = arith.constant 0 : i32
    %c0_i32_0 = arith.constant 0 : i32
    %c0_i32_1 = arith.constant 0 : i32
    return %c0_i32, %c0_i32_0 : i32, i32
  }
  func.func @transform_6(%arg0: i32, %arg1: i32) -> (i32, i32) {
    %c0_i32 = arith.constant 0 : i32
    %c0_i32_0 = arith.constant 0 : i32
    %c0_i32_1 = arith.constant 0 : i32
    return %c0_i32, %c0_i32_0 : i32, i32
  }
  func.func @transform_7(%arg0: i32, %arg1: i32) -> (i32, i32, i32) {
    %c0_i32 = arith.constant 0 : i32
    %c0_i32_0 = arith.constant 0 : i32
    %c0_i32_1 = arith.constant 0 : i32
    %c0_i32_2 = arith.constant 0 : i32
    return %c0_i32, %c0_i32_0, %c0_i32_1 : i32, i32, i32
  }
  func.func @transform_8(%arg0: i32, %arg1: i32) -> (i32, i32) {
    %c0_i32 = arith.constant 0 : i32
    %c0_i32_0 = arith.constant 0 : i32
    %c0_i32_1 = arith.constant 0 : i32
    return %c0_i32, %c0_i32_0 : i32, i32
  }
  func.func @transform_9(%arg0: i32, %arg1: i32) -> (i32, i32, i32) {
    %c0_i32 = arith.constant 0 : i32
    %c0_i32_0 = arith.constant 0 : i32
    %c0_i32_1 = arith.constant 0 : i32
    %c0_i32_2 = arith.constant 0 : i32
    return %c0_i32, %c0_i32_0, %c0_i32_1 : i32, i32, i32
  }
  func.func @transform_10(%arg0: i32, %arg1: i32) -> (i32, i32) {
    %c0_i32 = arith.constant 0 : i32
    %c0_i32_0 = arith.constant 0 : i32
    %c0_i32_1 = arith.constant 0 : i32
    return %c0_i32, %c0_i32_0 : i32, i32
  }
  func.func @transform_11(%arg0: i32, %arg1: i32) -> (i32, i32) {
    %c0_i32 = arith.constant 0 : i32
    %c0_i32_0 = arith.constant 0 : i32
    return %arg0, %c0_i32 : i32, i32
  }
}

module attributes {stable_mosaic.version = 11 : i64} {
  func.func @_critic_kernel(%arg0: i32, %arg1: i32, %arg2: memref<8x64xf32, #tpu.memory_space<vmem>>, %arg3: memref<8x4xf32, #tpu.memory_space<vmem>>, %arg4: memref<64x128xf32, #tpu.memory_space<vmem>>, %arg5: memref<3x128xf32, #tpu.memory_space<vmem>>, %arg6: memref<128x256xf32, #tpu.memory_space<vmem>>, %arg7: memref<4x256xf32, #tpu.memory_space<vmem>>, %arg8: memref<1x256xf32, #tpu.memory_space<vmem>>, %arg9: memref<2x128x128xf32, #tpu.memory_space<vmem>>, %arg10: memref<1x256xf32, #tpu.memory_space<vmem>>, %arg11: memref<2x128x128xf32, #tpu.memory_space<vmem>>, %arg12: memref<1x128xf32, #tpu.memory_space<vmem>>, %arg13: memref<8x128xf32, #tpu.memory_space<vmem>>, %arg14: memref<8x128xf32, #tpu.memory_space<vmem>>) attributes {dimension_semantics = [#tpu.dimension_semantics<parallel>, #tpu.dimension_semantics<arbitrary>], iteration_bounds = array<i64: 1, 1>, scalar_prefetch = 0 : i64, scratch_operands = 1 : i64, tpu.core_type = #tpu.core_type<tc>, window_params = [{transform_indices = @transform_0, window_bounds = array<i64: 8, 64>}, {transform_indices = @transform_1, window_bounds = array<i64: 8, 4>}, {transform_indices = @transform_2, window_bounds = array<i64: 64, 128>}, {pipeline_mode = #tpu.pipeline_mode<synchronous>, transform_indices = @transform_3, window_bounds = array<i64: 3, 128>}, {pipeline_mode = #tpu.pipeline_mode<synchronous>, transform_indices = @transform_4, window_bounds = array<i64: 128, 256>}, {pipeline_mode = #tpu.pipeline_mode<synchronous>, transform_indices = @transform_5, window_bounds = array<i64: 4, 256>}, {pipeline_mode = #tpu.pipeline_mode<synchronous>, transform_indices = @transform_6, window_bounds = array<i64: 1, 256>}, {pipeline_mode = #tpu.pipeline_mode<synchronous>, transform_indices = @transform_7, window_bounds = array<i64: 2, 128, 128>}, {pipeline_mode = #tpu.pipeline_mode<synchronous>, transform_indices = @transform_8, window_bounds = array<i64: 1, 256>}, {pipeline_mode = #tpu.pipeline_mode<synchronous>, transform_indices = @transform_9, window_bounds = array<i64: 2, 128, 128>}, {pipeline_mode = #tpu.pipeline_mode<synchronous>, transform_indices = @transform_10, window_bounds = array<i64: 1, 128>}, {transform_indices = @transform_11, window_bounds = array<i64: 8, 128>}]} {
    %c0_i32 = arith.constant 0 : i32
    %0 = arith.cmpi eq, %arg1, %c0_i32 : i32
    %1 = arith.extui %0 : i1 to i32
    %c0_i32_0 = arith.constant 0 : i32
    %2 = arith.cmpi ne, %1, %c0_i32_0 : i32
    scf.if %2 {
      %cst_10 = arith.constant 0.000000e+00 : f32
      %12 = vector.broadcast %cst_10 : f32 to vector<8x128xf32>
      %c0_11 = arith.constant 0 : index
      %c0_12 = arith.constant 0 : index
      %13 = vector.load %arg14[%c0_11, %c0_12] : memref<8x128xf32, #tpu.memory_space<vmem>>, vector<8x128xf32>
      tpu.vector_store %arg14[%c0_11, %c0_12], %12 {strides = array<i32>} : memref<8x128xf32, #tpu.memory_space<vmem>>, vector<8x128xf32>,
    } else {
    }
    %c0 = arith.constant 0 : index
    %c0_1 = arith.constant 0 : index
    %3 = vector.load %arg2[%c0, %c0_1] : memref<8x64xf32, #tpu.memory_space<vmem>>, vector<8x64xf32>
    %c0_2 = arith.constant 0 : index
    %c0_3 = arith.constant 0 : index
    %4 = vector.load %arg14[%c0_2, %c0_3] : memref<8x128xf32, #tpu.memory_space<vmem>>, vector<8x128xf32>
    %c0_4 = arith.constant 0 : index
    %c0_5 = arith.constant 0 : index
    %5 = vector.load %arg4[%c0_4, %c0_5] : memref<64x128xf32, #tpu.memory_space<vmem>>, vector<64x128xf32>
    %cst = arith.constant dense<0.000000e+00> : vector<8x128xf32>
    %6 = tpu.matmul %3, %5, %cst {dimension_numbers = #tpu.dot_dimension_numbers<[1], [0], [0], [1], [0, 0, 1, 1], [], []>} : vector<8x64xf32>, vector<64x128xf32>, vector<8x128xf32> -> vector<8x128xf32>
    %7 = arith.addf %4, %6 : vector<8x128xf32>
    %c0_6 = arith.constant 0 : index
    %c0_7 = arith.constant 0 : index
    %8 = vector.load %arg14[%c0_6, %c0_7] : memref<8x128xf32, #tpu.memory_space<vmem>>, vector<8x128xf32>
    tpu.vector_store %arg14[%c0_6, %c0_7], %7 {strides = array<i32>} : memref<8x128xf32, #tpu.memory_space<vmem>>, vector<8x128xf32>,
    %c0_i32_8 = arith.constant 0 : i32
    %9 = arith.cmpi eq, %arg1, %c0_i32_8 : i32
    %10 = arith.extui %9 : i1 to i32
    %c0_i32_9 = arith.constant 0 : i32
    %11 = arith.cmpi ne, %10, %c0_i32_9 : i32
    scf.if %11 {
      %c0_10 = arith.constant 0 : index
      %c0_11 = arith.constant 0 : index
      %12 = vector.load %arg14[%c0_10, %c0_11] : memref<8x128xf32, #tpu.memory_space<vmem>>, vector<8x128xf32>
      %c0_12 = arith.constant 0 : index
      %c0_13 = arith.constant 0 : index
      %13 = vector.load %arg5[%c0_12, %c0_13] : memref<3x128xf32, #tpu.memory_space<vmem>>, vector<1x128xf32>
      %14 = vector.broadcast %13 : vector<1x128xf32> to vector<8x128xf32>
      %15 = arith.addf %12, %14 : vector<8x128xf32>
      %cst_14 = arith.constant dense<0.000000e+00> : vector<8xf32>
      %16 = vector.multi_reduction <add>, %15, %cst_14 [1] : vector<8x128xf32> to vector<8xf32>
      %17 = vector.shape_cast %16 : vector<8xf32> to vector<8x1xf32>
      %cst_15 = arith.constant 3.125000e-02 : f32
      %18 = vector.broadcast %cst_15 : f32 to vector<8x1xf32>
      %19 = arith.mulf %17, %18 : vector<8x1xf32>
      %20 = vector.broadcast %19 : vector<8x1xf32> to vector<8x128xf32>
      %21 = arith.subf %15, %20 : vector<8x128xf32>
      %22 = tpu.iota {dimensions = array<i32: 1>} : vector<8x128xi32>
      %c32_i32 = arith.constant 32 : i32
      %23 = vector.broadcast %c32_i32 : i32 to vector<8x128xi32>
      %24 = arith.cmpi slt, %22, %23 : vector<8x128xi32>
      %cst_16 = arith.constant 0.000000e+00 : f32
      %25 = vector.broadcast %cst_16 : f32 to vector<8x128xf32>
      %26 = arith.select %24, %21, %25 : vector<8x128xi1>, vector<8x128xf32>
      %27 = arith.mulf %26, %26 : vector<8x128xf32>
      %cst_17 = arith.constant dense<0.000000e+00> : vector<8xf32>
      %28 = vector.multi_reduction <add>, %27, %cst_17 [1] : vector<8x128xf32> to vector<8xf32>
      %29 = vector.shape_cast %28 : vector<8xf32> to vector<8x1xf32>
      %cst_18 = arith.constant 3.125000e-02 : f32
      %30 = vector.broadcast %cst_18 : f32 to vector<8x1xf32>
      %31 = arith.mulf %29, %30 : vector<8x1xf32>
      %cst_19 = arith.constant 9.99999974E-6 : f32
      %32 = vector.broadcast %cst_19 : f32 to vector<8x1xf32>
      %33 = arith.addf %31, %32 : vector<8x1xf32>
      %34 = math.rsqrt %33 : vector<8x1xf32>
      %35 = vector.broadcast %34 : vector<8x1xf32> to vector<8x128xf32>
      %36 = arith.mulf %21, %35 : vector<8x128xf32>
      %c1 = arith.constant 1 : index
      %c0_20 = arith.constant 0 : index
      %37 = vector.load %arg5[%c1, %c0_20] : memref<3x128xf32, #tpu.memory_space<vmem>>, vector<1x128xf32>
      %38 = vector.broadcast %37 : vector<1x128xf32> to vector<8x128xf32>
      %39 = arith.mulf %36, %38 : vector<8x128xf32>
      %c2 = arith.constant 2 : index
      %c0_21 = arith.constant 0 : index
      %40 = vector.load %arg5[%c2, %c0_21] : memref<3x128xf32, #tpu.memory_space<vmem>>, vector<1x128xf32>
      %41 = vector.broadcast %40 : vector<1x128xf32> to vector<8x128xf32>
      %42 = arith.addf %39, %41 : vector<8x128xf32>
      %43 = math.tanh %42 : vector<8x128xf32>
      %c0_22 = arith.constant 0 : index
      %c0_23 = arith.constant 0 : index
      %44 = vector.load %arg3[%c0_22, %c0_23] : memref<8x4xf32, #tpu.memory_space<vmem>>, vector<8x4xf32>
      %c0_24 = arith.constant 0 : index
      %c0_25 = arith.constant 0 : index
      %45 = vector.load %arg6[%c0_24, %c0_25] : memref<128x256xf32, #tpu.memory_space<vmem>>, vector<128x256xf32>
      %cst_26 = arith.constant dense<0.000000e+00> : vector<8x256xf32>
      %46 = tpu.matmul %43, %45, %cst_26 {dimension_numbers = #tpu.dot_dimension_numbers<[1], [0], [0], [1], [0, 0, 1, 1], [], []>} : vector<8x128xf32>, vector<128x256xf32>, vector<8x256xf32> -> vector<8x256xf32>
      %c0_27 = arith.constant 0 : index
      %c0_28 = arith.constant 0 : index
      %47 = vector.load %arg7[%c0_27, %c0_28] : memref<4x256xf32, #tpu.memory_space<vmem>>, vector<4x256xf32>
      %cst_29 = arith.constant dense<0.000000e+00> : vector<8x256xf32>
      %48 = tpu.matmul %44, %47, %cst_29 {dimension_numbers = #tpu.dot_dimension_numbers<[1], [0], [0], [1], [0, 0, 1, 1], [], []>} : vector<8x4xf32>, vector<4x256xf32>, vector<8x256xf32> -> vector<8x256xf32>
      %49 = arith.addf %46, %48 : vector<8x256xf32>
      %c0_30 = arith.constant 0 : index
      %c0_31 = arith.constant 0 : index
      %50 = vector.load %arg8[%c0_30, %c0_31] : memref<1x256xf32, #tpu.memory_space<vmem>>, vector<1x256xf32>
      %51 = vector.broadcast %50 : vector<1x256xf32> to vector<8x256xf32>
      %52 = arith.addf %49, %51 : vector<8x256xf32>
      %cst_32 = arith.constant 0.000000e+00 : f32
      %53 = vector.broadcast %cst_32 : f32 to vector<8x256xf32>
      %54 = arith.maximumf %52, %53 : vector<8x256xf32>
      %55 = vector.extract_strided_slice %54 {offsets = [0, 0], sizes = [8, 128], strides = [1, 1]} : vector<8x256xf32> to vector<8x128xf32>
      %56 = vector.extract_strided_slice %54 {offsets = [0, 128], sizes = [8, 128], strides = [1, 1]} : vector<8x256xf32> to vector<8x128xf32>
      %c0_33 = arith.constant 0 : index
      %c0_34 = arith.constant 0 : index
      %c0_35 = arith.constant 0 : index
      %57 = vector.load %arg9[%c0_33, %c0_34, %c0_35] : memref<2x128x128xf32, #tpu.memory_space<vmem>>, vector<1x128x128xf32>
      %58 = vector.shape_cast %57 : vector<1x128x128xf32> to vector<128x128xf32>
      %cst_36 = arith.constant dense<0.000000e+00> : vector<8x128xf32>
      %59 = tpu.matmul %55, %58, %cst_36 {dimension_numbers = #tpu.dot_dimension_numbers<[1], [0], [0], [1], [0, 0, 1, 1], [], []>} : vector<8x128xf32>, vector<128x128xf32>, vector<8x128xf32> -> vector<8x128xf32>
      %c0_37 = arith.constant 0 : index
      %c0_38 = arith.constant 0 : index
      %60 = vector.load %arg10[%c0_37, %c0_38] : memref<1x256xf32, #tpu.memory_space<vmem>>, vector<1x128xf32>
      %61 = vector.broadcast %60 : vector<1x128xf32> to vector<8x128xf32>
      %62 = arith.addf %59, %61 : vector<8x128xf32>
      %cst_39 = arith.constant 0.000000e+00 : f32
      %63 = vector.broadcast %cst_39 : f32 to vector<8x128xf32>
      %64 = arith.maximumf %62, %63 : vector<8x128xf32>
      %c1_40 = arith.constant 1 : index
      %c0_41 = arith.constant 0 : index
      %c0_42 = arith.constant 0 : index
      %65 = vector.load %arg9[%c1_40, %c0_41, %c0_42] : memref<2x128x128xf32, #tpu.memory_space<vmem>>, vector<1x128x128xf32>
      %66 = vector.shape_cast %65 : vector<1x128x128xf32> to vector<128x128xf32>
      %cst_43 = arith.constant dense<0.000000e+00> : vector<8x128xf32>
      %67 = tpu.matmul %56, %66, %cst_43 {dimension_numbers = #tpu.dot_dimension_numbers<[1], [0], [0], [1], [0, 0, 1, 1], [], []>} : vector<8x128xf32>, vector<128x128xf32>, vector<8x128xf32> -> vector<8x128xf32>
      %c0_44 = arith.constant 0 : index
      %c128 = arith.constant 128 : index
      %68 = vector.load %arg10[%c0_44, %c128] : memref<1x256xf32, #tpu.memory_space<vmem>>, vector<1x128xf32>
      %69 = vector.broadcast %68 : vector<1x128xf32> to vector<8x128xf32>
      %70 = arith.addf %67, %69 : vector<8x128xf32>
      %cst_45 = arith.constant 0.000000e+00 : f32
      %71 = vector.broadcast %cst_45 : f32 to vector<8x128xf32>
      %72 = arith.maximumf %70, %71 : vector<8x128xf32>
      %c0_46 = arith.constant 0 : index
      %c0_47 = arith.constant 0 : index
      %c0_48 = arith.constant 0 : index
      %73 = vector.load %arg11[%c0_46, %c0_47, %c0_48] : memref<2x128x128xf32, #tpu.memory_space<vmem>>, vector<1x128x128xf32>
      %74 = vector.shape_cast %73 : vector<1x128x128xf32> to vector<128x128xf32>
      %cst_49 = arith.constant dense<0.000000e+00> : vector<8x128xf32>
      %75 = tpu.matmul %64, %74, %cst_49 {dimension_numbers = #tpu.dot_dimension_numbers<[1], [0], [0], [1], [0, 0, 1, 1], [], []>} : vector<8x128xf32>, vector<128x128xf32>, vector<8x128xf32> -> vector<8x128xf32>
      %c1_50 = arith.constant 1 : index
      %c0_51 = arith.constant 0 : index
      %c0_52 = arith.constant 0 : index
      %76 = vector.load %arg11[%c1_50, %c0_51, %c0_52] : memref<2x128x128xf32, #tpu.memory_space<vmem>>, vector<1x128x128xf32>
      %77 = vector.shape_cast %76 : vector<1x128x128xf32> to vector<128x128xf32>
      %cst_53 = arith.constant dense<0.000000e+00> : vector<8x128xf32>
      %78 = tpu.matmul %72, %77, %cst_53 {dimension_numbers = #tpu.dot_dimension_numbers<[1], [0], [0], [1], [0, 0, 1, 1], [], []>} : vector<8x128xf32>, vector<128x128xf32>, vector<8x128xf32> -> vector<8x128xf32>
      %79 = arith.addf %75, %78 : vector<8x128xf32>
      %c0_54 = arith.constant 0 : index
      %c0_55 = arith.constant 0 : index
      %80 = vector.load %arg12[%c0_54, %c0_55] : memref<1x128xf32, #tpu.memory_space<vmem>>, vector<1x128xf32>
      %81 = vector.broadcast %80 : vector<1x128xf32> to vector<8x128xf32>
      %82 = arith.addf %79, %81 : vector<8x128xf32>
      %c0_56 = arith.constant 0 : index
      %c0_57 = arith.constant 0 : index
      %83 = vector.load %arg13[%c0_56, %c0_57] : memref<8x128xf32, #tpu.memory_space<vmem>>, vector<8x128xf32>
      tpu.vector_store %arg13[%c0_56, %c0_57], %82 {strides = array<i32>} : memref<8x128xf32, #tpu.memory_space<vmem>>, vector<8x128xf32>,
    } else {
    }
    return
  }
  func.func @transform_0(%arg0: i32, %arg1: i32) -> (i32, i32) {
    %c0_i32 = arith.constant 0 : i32
    return %arg0, %arg1 : i32, i32
  }
  func.func @transform_1(%arg0: i32, %arg1: i32) -> (i32, i32) {
    %c0_i32 = arith.constant 0 : i32
    %c0_i32_0 = arith.constant 0 : i32
    return %arg0, %c0_i32 : i32, i32
  }
  func.func @transform_2(%arg0: i32, %arg1: i32) -> (i32, i32) {
    %c0_i32 = arith.constant 0 : i32
    %c0_i32_0 = arith.constant 0 : i32
    return %arg1, %c0_i32 : i32, i32
  }
  func.func @transform_3(%arg0: i32, %arg1: i32) -> (i32, i32) {
    %c0_i32 = arith.constant 0 : i32
    %c0_i32_0 = arith.constant 0 : i32
    %c0_i32_1 = arith.constant 0 : i32
    return %c0_i32, %c0_i32_0 : i32, i32
  }
  func.func @transform_4(%arg0: i32, %arg1: i32) -> (i32, i32) {
    %c0_i32 = arith.constant 0 : i32
    %c0_i32_0 = arith.constant 0 : i32
    %c0_i32_1 = arith.constant 0 : i32
    return %c0_i32, %c0_i32_0 : i32, i32
  }
  func.func @transform_5(%arg0: i32, %arg1: i32) -> (i32, i32) {
    %c0_i32 = arith.constant 0 : i32
    %c0_i32_0 = arith.constant 0 : i32
    %c0_i32_1 = arith.constant 0 : i32
    return %c0_i32, %c0_i32_0 : i32, i32
  }
  func.func @transform_6(%arg0: i32, %arg1: i32) -> (i32, i32) {
    %c0_i32 = arith.constant 0 : i32
    %c0_i32_0 = arith.constant 0 : i32
    %c0_i32_1 = arith.constant 0 : i32
    return %c0_i32, %c0_i32_0 : i32, i32
  }
  func.func @transform_7(%arg0: i32, %arg1: i32) -> (i32, i32, i32) {
    %c0_i32 = arith.constant 0 : i32
    %c0_i32_0 = arith.constant 0 : i32
    %c0_i32_1 = arith.constant 0 : i32
    %c0_i32_2 = arith.constant 0 : i32
    return %c0_i32, %c0_i32_0, %c0_i32_1 : i32, i32, i32
  }
  func.func @transform_8(%arg0: i32, %arg1: i32) -> (i32, i32) {
    %c0_i32 = arith.constant 0 : i32
    %c0_i32_0 = arith.constant 0 : i32
    %c0_i32_1 = arith.constant 0 : i32
    return %c0_i32, %c0_i32_0 : i32, i32
  }
  func.func @transform_9(%arg0: i32, %arg1: i32) -> (i32, i32, i32) {
    %c0_i32 = arith.constant 0 : i32
    %c0_i32_0 = arith.constant 0 : i32
    %c0_i32_1 = arith.constant 0 : i32
    %c0_i32_2 = arith.constant 0 : i32
    return %c0_i32, %c0_i32_0, %c0_i32_1 : i32, i32, i32
  }
  func.func @transform_10(%arg0: i32, %arg1: i32) -> (i32, i32) {
    %c0_i32 = arith.constant 0 : i32
    %c0_i32_0 = arith.constant 0 : i32
    %c0_i32_1 = arith.constant 0 : i32
    return %c0_i32, %c0_i32_0 : i32, i32
  }
  func.func @transform_11(%arg0: i32, %arg1: i32) -> (i32, i32) {
    %c0_i32 = arith.constant 0 : i32
    %c0_i32_0 = arith.constant 0 : i32
    return %arg0, %c0_i32 : i32, i32
  }
}

</mosaic_0001>

<bundles_post_ra>
// kernel: tpu_custom_call.1
= control target key start
LH: loop header
LB: loop body
LE: loop exit
PB: predicated region body
PF: predicated region fallthrough
CT: control target
= control target key end

     0   :  { %16 = vsyncpa [#allocation4], 0  ;;  %s1569_s0 = inlined_call_operand.vmem [shape: f32[8,64], index: 0, kind: input, shape index: {}]   ;;  %s1570_s1 = inlined_call_operand.vmem [shape: f32[8,4], index: 1, kind: input, shape index: {}]   ;;  %s1571_s2 = inlined_call_operand.hbm [shape: f32[64,128], index: 2, kind: input, shape index: {}]   ;;  %s1572_s3 = inlined_call_operand.vmem [shape: f32[3,128], index: 3, kind: input, shape index: {}]   ;;  %s1573_s4 = inlined_call_operand.hbm [shape: f32[128,256], index: 4, kind: input, shape index: {}]   ;;  %s1574_s5 = inlined_call_operand.vmem [shape: f32[4,256], index: 5, kind: input, shape index: {}]   ;;  %s1575_s6 = inlined_call_operand.vmem [shape: f32[1,256], index: 6, kind: input, shape index: {}]   ;;  %s1576_s7 = inlined_call_operand.hbm [shape: f32[2,128,128], index: 7, kind: input, shape index: {}]   ;;  %s1577_s8 = inlined_call_operand.vmem [shape: f32[1,256], index: 8, kind: input, shape index: {}]   ;;  %s1578_s9 = inlined_call_operand.hbm [shape: f32[2,128,128], index: 9, kind: input, shape index: {}]   ;;  %s1579_s10 = inlined_call_operand.vmem [shape: f32[1,128], index: 10, kind: input, shape index: {}]   ;;  %s1580_s11 = inlined_call_operand.hbm [shape: f32[8,128], index: 11, kind: output, shape index: {}]  }
   0x1   :  { %17 = vsyncpa [#allocation7], 0 }
   0x2   :  { %18 = vsyncpa [#allocation10], 0 }
   0x3   :  { %19 = vsyncpa [#allocation5], 0  ;;  %s1337_s17 = smov [#allocation6]   ;;  %s1219_s21 = scalar_lea.hbm %s1573_s4, 4096 }
   0x4   :  { %s43_s18 = sshll.u32 %s1337_s17, 4  ;;  %p1220_p0 = scmp.ne.s32.totalorder %s1573_s4, %s1219_s21  ;;  %s44_s18 = int_to_ptr.vmem [resolvable:$true] %s43_s18 }
   0x5   :  { %p1223_p1 = scmp.lt.u32.totalorder %s1219_s21, %s1573_s4 }
   0x7   :  { %p1225_p2 = pnand %p1223_p1, %p1220_p0 }
   0x9   :  { %1228 = shalt.err (!%p1225_p2)
}
   0xa   :  { %s1229_s26 = scalar_lea.vmem %s44_s18, 4096  ;;  %p1234_p4 = scmp.lt.s32.totalorder %s44_s18, %s44_s18 }
   0xb   :  { %p1230_p3 = scmp.ne.s32.totalorder %s44_s18, %s1229_s26  ;;  %p1235_p5 = scmp.lt.s32.totalorder %s1229_s26, %s1229_s26 }
   0xd   :  { %p1236_p6 = por %p1235_p5, %p1234_p4 }
   0xf   :  { %p1237_p7 = pnand %p1236_p6, %p1230_p3 }
  0x11   :  { %1240 = shalt.err (!%p1237_p7)
}
  0x12   :  { %s1338_s27 = smov 256   ;;  %s1339_s28 = smov 16  }
  0x13   :  { %49 = dma.hbm_to_vmem [thread:$0]  %s1573_s4, 4096, %s44_s18, [#allocation7], %s1338_s27, %s1338_s27, %s1339_s28  }
  0x14   :  { %s1340_s12 = smov [#allocation3]   ;;  %s1241_s16 = scalar_lea.hbm %s1571_s2, 1024 }
  0x15   :  { %s29_s13 = sshll.u32 %s1340_s12, 4  ;;  %p1242_p8 = scmp.ne.s32.totalorder %s1571_s2, %s1241_s16  ;;  %s30_s13 = int_to_ptr.vmem [resolvable:$true] %s29_s13 }
  0x16   :  { %p1245_p9 = scmp.lt.u32.totalorder %s1241_s16, %s1571_s2 }
  0x18   :  { %p1247_p10 = pnand %p1245_p9, %p1242_p8 }
  0x1a   :  { %1250 = shalt.err (!%p1247_p10)
}
  0x1b   :  { %s1251_s22 = scalar_lea.vmem %s30_s13, 1024  ;;  %p1256_p12 = scmp.lt.s32.totalorder %s30_s13, %s30_s13 }
  0x1c   :  { %p1252_p11 = scmp.ne.s32.totalorder %s30_s13, %s1251_s22  ;;  %p1257_p13 = scmp.lt.s32.totalorder %s1251_s22, %s1251_s22 }
  0x1e   :  { %p1258_p0 = por %p1257_p13, %p1256_p12 }
  0x20   :  { %p1259_p1 = pnand %p1258_p0, %p1252_p11 }
  0x22   :  { %1262 = shalt.err (!%p1259_p1)
}
  0x23   :  { %s1341_s4 = smov 128   ;;  %s1342_s18 = smov 8  }
  0x24   :  { %35 = dma.hbm_to_vmem [thread:$0]  %s1571_s2, 1024, %s30_s13, [#allocation4], %s1341_s4, %s1341_s4, %s1342_s18  }
  0x25   :  { %s1343_s25 = smov [#allocation8]   ;;  %s1344_s27 = smov [#allocation9]  }
  0x26   :  { %s59_s26 = sshll.u32 %s1343_s25, 4  ;;  %s73_s28 = sshll.u32 %s1344_s27, 4  ;;  %s60_s26 = int_to_ptr.vmem [resolvable:$true] %s59_s26  ;;  %s1436_s28 = int_to_ptr.vmem [resolvable:$true] %s73_s28 }
  0x27   :  { %s1263_s12 = scalar_lea.hbm %s1576_s7, 4096 }
  0x28   :  { %p1264_p2 = scmp.ne.s32.totalorder %s1576_s7, %s1263_s12  ;;  %p1267_p3 = scmp.lt.u32.totalorder %s1263_s12, %s1576_s7 }
  0x2a   :  { %p1269_p4 = pnand %p1267_p3, %p1264_p2 }
  0x2c   :  { %1272 = shalt.err (!%p1269_p4)
}
  0x2d   :  { %s1273_s2 = scalar_lea.vmem %s60_s26, 4096  ;;  %p1278_p6 = scmp.lt.s32.totalorder %s60_s26, %s60_s26 }
  0x2e   :  { %p1274_p5 = scmp.ne.s32.totalorder %s60_s26, %s1273_s2  ;;  %p1279_p7 = scmp.lt.s32.totalorder %s1273_s2, %s1273_s2 }
  0x30   :  { %p1280_p8 = por %p1279_p7, %p1278_p6 }
  0x32   :  { %p1281_p9 = pnand %p1280_p8, %p1274_p5 }
  0x34   :  { %1284 = shalt.err (!%p1281_p9)
}
  0x35   :  { %65 = dma.hbm_to_vmem [thread:$0]  %s1576_s7, 4096, %s60_s26, [#allocation7], %s1341_s4, %s1341_s4, %s1342_s18  }
  0x36   :  { %s1285_s22 = scalar_lea.hbm %s1578_s9, 4096 }
  0x37   :  { %p1286_p10 = scmp.ne.s32.totalorder %s1578_s9, %s1285_s22  ;;  %p1289_p11 = scmp.lt.u32.totalorder %s1285_s22, %s1578_s9 }
  0x39   :  { %p1291_p12 = pnand %p1289_p11, %p1286_p10 }
  0x3b   :  { %1294 = shalt.err (!%p1291_p12)
}
  0x3c   :  { %s1295_s29 = scalar_lea.vmem %s1436_s28, 4096  ;;  %p1300_p0 = scmp.lt.s32.totalorder %s1436_s28, %s1436_s28 }
  0x3d   :  { %p1296_p13 = scmp.ne.s32.totalorder %s1436_s28, %s1295_s29  ;;  %p1301_p1 = scmp.lt.s32.totalorder %s1295_s29, %s1295_s29 }
  0x3f   :  { %p1302_p2 = por %p1301_p1, %p1300_p0 }
  0x41   :  { %p1303_p3 = pnand %p1302_p2, %p1296_p13 }
  0x43   :  { %1306 = shalt.err (!%p1303_p3)
}
  0x44   :  { %79 = dma.hbm_to_vmem [thread:$0]  %s1578_s9, 4096, %s1436_s28, [#allocation10], %s1341_s4, %s1341_s4, %s1342_s18  }
  0x45   :  { %1329 = dma.done.wait [#allocation4], 1024  }
  0x46   :  { %1330 = vsyncadd [#allocation4], 4294966272 }
  0x47   :  { %1331 = dma.done.wait [#allocation7], 8192  }
  0x48   :  { %1332 = vsyncadd [#allocation7], 4294959104 }
  0x49   :  { %1333 = dma.done.wait [#allocation10], 4096  }
  0x4a   :  { %1334 = vsyncadd [#allocation10], 4294963200  ;;  %v1345_v0 = vmov 0.0|0.0   ;;  %vm1346_vm0 = vmmov 0   ;;  %v1347_v1 = vmov 0.0   ;;  %v101_v2 = vld [vmem:[#allocation3] sm:$0xff]  ;;  %v199_v19 = vlaneseq }
  0x4b   :  { %1060 = vmatprep.subr.bf16.mxu0 %v1345_v0  ;;  %917 = vmatprep.mubr.msk.f32.mxu0 %vm1346_vm0, %v1347_v1  ;;  %v102_v3 = vld [vmem:[#allocation3 + $0x8] sm:$0xff]  ;;  %v103_v4 = vld [vmem:[#allocation3 + $0x10] sm:$0xff]  ;;  %v104_v6 = vld [vmem:[#allocation3 + $0x18] sm:$0xff]  ;;  %vm109_vm1 = vcmask 523264   ;;  %vm263_vm3 = vcmask 1043456   ;;  %vm259_vm4 = vcmask 31744  }
  0x4c   :  { %403 = vmatprep.mubr.f32.mxu1 %v1347_v1  ;;  %v1061_v5 = vpack.c.bf16 %v102_v3, %v101_v2  ;;  %v1064_v7 = vpack.c.bf16 %v104_v6, %v103_v4  ;;  %v105_v8 = vld [vmem:[#allocation3 + $0x20] sm:$0xff]  ;;  %v106_v9 = vld [vmem:[#allocation3 + $0x28] sm:$0xff]  ;;  %v107_v11 = vld [vmem:[#allocation3 + $0x30] sm:$0xff]  ;;  %v200_v20 = vand.u32 127, %v199_v19  ;;  %s1348_s22 = smov [#allocation11]  }
  0x4d   :  { %v1067_v10 = vpack.c.bf16 %v106_v9, %v105_v8  ;;  %v108_v12 = vld [vmem:[#allocation3 + $0x38] sm:$0xff]  ;;  %v99_v14 = vld [vmem:[%s1569_s0] sm:$0xff]  ;;  %v225_v26 = vld [vmem:[#allocation6 + $0x8] sm:$0xff]  ;;  %s803_s23 = sshll.u32 %s1348_s22, 4  ;;  %s804_s23 = int_to_ptr.vmem [resolvable:$true] %s803_s23 }
  0x4e   :  { %1062 = vmatpush3.bf16.msra.mxu0 %v1061_v5  ;;  %v1070_v13 = vpack.c.bf16 %v108_v12, %v107_v11  ;;  %v815_v15 = vld [vmem:[%s1572_s3] ss:$0 sm:$0xff]  ;;  %vm201_vm2 = vcmp.lt.s32.totalorder %v200_v20, 32  ;;  %v227_v27 = vld [vmem:[#allocation6 + $0x18] sm:$0xff]  ;;  %v226_v30 = vld [vmem:[#allocation6 + $0x10] sm:$0xff]  ;;  %p1312_p5 = scmp.lt.s32.totalorder %s804_s23, %s804_s23 }
  0x4f   :  { %1063 = vmatprep.subr.bf16.mxu0 %v1345_v0  ;;  %v1072_v28 = vpack.c.bf16 %v227_v27, %v225_v26  ;;  %v224_v29 = vld [vmem:[#allocation6] sm:$0xff]  ;;  %v229_v32 = vld [vmem:[#allocation6 + $0x28] sm:$0xff]  ;;  %v231_v33 = vld [vmem:[#allocation6 + $0x38] sm:$0xff] }
  0x50   :  { %v1074_v31 = vpack.c.bf16 %v226_v30, %v224_v29  ;;  %v1076_v34 = vpack.c.bf16 %v231_v33, %v229_v32  ;;  %v228_v35 = vld [vmem:[#allocation6 + $0x20] sm:$0xff]  ;;  %v230_v36 = vld [vmem:[#allocation6 + $0x30] sm:$0xff]  ;;  %v233_v38 = vld [vmem:[#allocation6 + $0x48] sm:$0xff] }
  0x51   :  { %1073 = vmatprep.subr.bf16.mxu1 %v1072_v28  ;;  %v1078_v37 = vpack.c.bf16 %v230_v36, %v228_v35  ;;  %v235_v39 = vld [vmem:[#allocation6 + $0x58] sm:$0xff]  ;;  %v232_v41 = vld [vmem:[#allocation6 + $0x40] sm:$0xff]  ;;  %v234_v42 = vld [vmem:[#allocation6 + $0x50] sm:$0xff] }
  0x52   :  { %1065 = vmatpush3.bf16.msra.mxu0 %v1064_v7  ;;  %1075 = vmatpush1.bf16.msra.mxu1 %v1074_v31  ;;  %v1080_v40 = vpack.c.bf16 %v235_v39, %v233_v38  ;;  %v1082_v43 = vpack.c.bf16 %v234_v42, %v232_v41  ;;  %v237_v44 = vld [vmem:[#allocation6 + $0x68] sm:$0xff]  ;;  %v239_v45 = vld [vmem:[#allocation6 + $0x78] sm:$0xff]  ;;  %v236_v47 = vld [vmem:[#allocation6 + $0x60] sm:$0xff] }
  0x53   :  { %1066 = vmatprep.subr.bf16.mxu0 %v1345_v0  ;;  %1077 = vmatprep.subr.bf16.mxu1 %v1076_v34  ;;  %v1084_v46 = vpack.c.bf16 %v239_v45, %v237_v44  ;;  %v238_v48 = vld [vmem:[#allocation6 + $0x70] sm:$0xff]  ;;  %v241_v50 = vld [vmem:[#allocation6 + $0x88] sm:$0xff]  ;;  %v243_v51 = vld [vmem:[#allocation6 + $0x98] sm:$0xff] }
  0x54   :  { %v1086_v49 = vpack.c.bf16 %v238_v48, %v236_v47  ;;  %v1088_v52 = vpack.c.bf16 %v243_v51, %v241_v50  ;;  %v240_v53 = vld [vmem:[#allocation6 + $0x80] sm:$0xff]  ;;  %v242_v54 = vld [vmem:[#allocation6 + $0x90] sm:$0xff]  ;;  %v245_v56 = vld [vmem:[#allocation6 + $0xa8] sm:$0xff] }
  0x55   :  { %v1090_v55 = vpack.c.bf16 %v242_v54, %v240_v53  ;;  %v247_v57 = vld [vmem:[#allocation6 + $0xb8] sm:$0xff]  ;;  %v244_v59 = vld [vmem:[#allocation6 + $0xa0] sm:$0xff]  ;;  %v246_v60 = vld [vmem:[#allocation6 + $0xb0] sm:$0xff] }
  0x56   :  { %1068 = vmatpush3.bf16.msra.mxu0 %v1067_v10  ;;  %1079 = vmatpush1.bf16.msra.mxu1 %v1078_v37  ;;  %v1092_v58 = vpack.c.bf16 %v247_v57, %v245_v56  ;;  %v1094_v61 = vpack.c.bf16 %v246_v60, %v244_v59  ;;  %v249_v62 = vld [vmem:[#allocation6 + $0xc8] sm:$0xff]  ;;  %v251_v63 = vld [vmem:[#allocation6 + $0xd8] sm:$0xff]  ;;  %v248_v2 = vld [vmem:[#allocation6 + $0xc0] sm:$0xff] }
  0x57   :  { %1069 = vmatprep.subr.bf16.mxu0 %v1345_v0  ;;  %1081 = vmatprep.subr.bf16.mxu1 %v1080_v40  ;;  %v1096_v3 = vpack.c.bf16 %v251_v63, %v249_v62  ;;  %v250_v4 = vld [vmem:[#allocation6 + $0xd0] sm:$0xff]  ;;  %v256_v5 = vld [vmem:[%s1574_s5] sm:$0xff]  ;;  %v253_v6 = vld [vmem:[#allocation6 + $0xe8] sm:$0xff] }
  0x58   :  { %v1098_v7 = vpack.c.bf16 %v250_v4, %v248_v2  ;;  %v258_v8 = vcombine.high %v256_v5, %v256_v5  ;;  %v255_v9 = vld [vmem:[#allocation6 + $0xf8] sm:$0xff]  ;;  %v252_v10 = vld [vmem:[#allocation6 + $0xe0] sm:$0xff]  ;;  %v254_v11 = vld [vmem:[#allocation6 + $0xf0] sm:$0xff] }
  0x59   :  { %v1100_v12 = vpack.c.bf16 %v255_v9, %v253_v6  ;;  %v429_v20 = vld [vmem:[#allocation8 + $0x18] sm:$0xff]  ;;  %v432_v26 = vld [vmem:[#allocation8 + $0x30] sm:$0xff]  ;;  %v434_v29 = vld [vmem:[#allocation8 + $0x40] sm:$0xff] }
  0x5a   :  { %1071 = vmatpush3.bf16.msra.mxu0 %v1070_v13  ;;  %1083 = vmatpush1.bf16.msra.mxu1 %v1082_v43  ;;  %v223_v13 = vld [vmem:[%s1570_s1] sm:$0xff]  ;;  %v433_v27 = vld [vmem:[#allocation8 + $0x38] sm:$0xff]  ;;  %v435_v30 = vld [vmem:[#allocation8 + $0x48] sm:$0xff] }
  0x5b   :  { %1085 = vmatprep.subr.bf16.mxu1 %v1084_v46  ;;  %818 = vmatprep.subr.msk.mxu0 %vm263_vm3, %v258_v8  ;;  %v1114_v28 = vpack.c.bf16 %v433_v27, %v432_v26  ;;  %v1117_v31 = vpack.c.bf16 %v435_v30, %v434_v29  ;;  %v436_v32 = vld [vmem:[#allocation8 + $0x50] sm:$0xff]  ;;  %v437_v33 = vld [vmem:[#allocation8 + $0x58] sm:$0xff]  ;;  %v816_v39 = vld [vmem:[%s1572_s3 + $0x1] ss:$0 sm:$0xff] }
  0x5c   :  { %v1120_v34 = vpack.c.bf16 %v437_v33, %v436_v32  ;;  %v817_v41 = vld [vmem:[%s1572_s3 + $0x2] ss:$0 sm:$0xff]  ;;  %v522_v45 = vld [vmem:[#allocation8 + $0x88] sm:$0xff]  ;;  %v523_v47 = vld [vmem:[#allocation8 + $0x90] sm:$0xff] }
  0x5d   :  { %918 = vmatmul.mubr.msk.f32.vlgmr.msra.gmra.mrb[0].mxu0 %vm109_vm1, %v99_v14  ;;  %v1102_v14 = vpack.c.bf16 %v254_v11, %v252_v10  ;;  %v521_v44 = vld [vmem:[#allocation8 + $0x80] sm:$0xff]  ;;  %v524_v48 = vld [vmem:[#allocation8 + $0x98] sm:$0xff]  ;;  %v526_v51 = vld [vmem:[#allocation8 + $0xa8] sm:$0xff] }
  0x5e   :  { %332 = vmatprep.mubr.f32.mxu0 %v1347_v1  ;;  %1087 = vmatpush1.bf16.msra.mxu1 %v1086_v49  ;;  %v1129_v46 = vpack.c.bf16 %v522_v45, %v521_v44  ;;  %v1132_v50 = vpack.c.bf16 %v524_v48, %v523_v47  ;;  %v527_v53 = vld [vmem:[#allocation8 + $0xb0] sm:$0xff]  ;;  %v528_v54 = vld [vmem:[#allocation8 + $0xb8] sm:$0xff]  ;;  %v529_v56 = vld [vmem:[#allocation8 + $0xc0] sm:$0xff] }
  0x5f   :  { %1089 = vmatprep.subr.bf16.mxu1 %v1088_v52  ;;  %819 = vmatpush1.msk.msra.mxu0 %vm263_vm3, %v256_v5  ;;  %v530_v57 = vld [vmem:[#allocation8 + $0xc8] sm:$0xff]  ;;  %v531_v59 = vld [vmem:[#allocation8 + $0xd0] sm:$0xff]  ;;  %v532_v60 = vld [vmem:[#allocation8 + $0xd8] sm:$0xff] }
  0x60   :  { %1104 = vmatprep.subr.bf16.mxu0 %v1345_v0  ;;  %v438_v2 = vld [vmem:[#allocation8 + $0x60] sm:$0xff]  ;;  %v534_v6 = vld [vmem:[#allocation8 + $0xe8] sm:$0xff]  ;;  %v440_v8 = vld [vmem:[#allocation8 + $0x70] sm:$0xff] }
  0x61   :  { %820 = vmatmul.mubr.msk.f32.vlgmr.msra.gmra.mrb[2].mxu0 %vm259_vm4, %v223_v13  ;;  %v533_v5 = vld [vmem:[#allocation8 + $0xe0] sm:$0xff]  ;;  %v441_v9 = vld [vmem:[#allocation8 + $0x78] sm:$0xff]  ;;  %v535_v11 = vld [vmem:[#allocation8 + $0xf0] sm:$0xff] }
  0x62   :  { %1091 = vmatpush1.bf16.msra.mxu1 %v1090_v55  ;;  %952 = vmatprep.mubr.msk.f32.mxu0 %vm1346_vm0, %v1347_v1  ;;  %v1138_v55 = vpack.c.bf16 %v528_v54, %v527_v53  ;;  %v1126_v10 = vpack.c.bf16 %v441_v9, %v440_v8  ;;  %v633_v26 = vld [vmem:[#allocation9 + $0x88] sm:$0xff]  ;;  %v638_v47 = vld [vmem:[#allocation9 + $0xb0] sm:$0xff]  ;;  %v639_v48 = vld [vmem:[#allocation9 + $0xb8] sm:$0xff] }
  0x63   :  { %1093 = vmatprep.subr.bf16.mxu1 %v1092_v58  ;;  %v1141_v58 = vpack.c.bf16 %v530_v57, %v529_v56  ;;  %v616_v29 = vld [vmem:[#allocation9 + $0x8] sm:$0xff]  ;;  %v623_v53 = vld [vmem:[#allocation9 + $0x40] sm:$0xff]  ;;  %v642_v57 = vld [vmem:[#allocation9 + $0xd0] sm:$0xff] }
  0x64   :  { %v620_v44 = vld [vmem:[#allocation9 + $0x28] sm:$0xff]  ;;  %v630_v8 = vld [vmem:[#allocation9 + $0x78] sm:$0xff] }
  0x65   :  { %v624_v54 = vld [vmem:[#allocation9 + $0x48] sm:$0xff] }
  0x66   :  { %1095 = vmatpush1.bf16.msra.mxu1 %v1094_v61  ;;  %v1144_v61 = vpack.c.bf16 %v532_v60, %v531_v59  ;;  %v1189_v56 = vpack.c.bf16 %v624_v54, %v623_v53  ;;  %v625_v59 = vld [vmem:[#allocation9 + $0x50] sm:$0xff]  ;;  %v626_v60 = vld [vmem:[#allocation9 + $0x58] sm:$0xff] }
  0x67   :  { %1097 = vmatprep.subr.bf16.mxu1 %v1096_v3  ;;  %v439_v3 = vld [vmem:[#allocation8 + $0x68] sm:$0xff] }
  0x68   :  { %v1123_v4 = vpack.c.bf16 %v439_v3, %v438_v2  ;;  %v645_v2 = vld [vmem:[#allocation9 + $0xe8] sm:$0xff]  ;;  %v627_v3 = vld [vmem:[#allocation9 + $0x60] sm:$0xff] }
  0x6a   :  { %1099 = vmatpush1.bf16.msra.mxu1 %v1098_v7  ;;  %v1147_v7 = vpack.c.bf16 %v534_v6, %v533_v5 }
  0x6b   :  { %1101 = vmatprep.subr.bf16.mxu1 %v1100_v12  ;;  %v536_v12 = vld [vmem:[#allocation8 + $0xf8] sm:$0xff] }
  0x6c   :  { %v1150_v13 = vpack.c.bf16 %v536_v12, %v535_v11  ;;  %v647_v11 = vld [vmem:[#allocation9 + $0xf8] sm:$0xff] }
  0x6e   :  { %1103 = vmatpush1.bf16.msra.mxu1 %v1102_v14  ;;  %v413_v14 = vshrl.u32 %v199_v19, 7 }
  0x6f   :  { %1128 = vmatprep.subr.bf16.mxu1 %v1345_v0 }
 0x130   :  { %v179_v16 = vpop.f32.mrb[0].mxu0 }
 0x131   :  { %v194_v17 = vadd.f32 %v815_v15, %v179_v16  ;;  %v919_v18 = vpop.f32.mrb[1].mxu0  ;;  %v426_v15 = vld [vmem:[#allocation8] sm:$0xff]  ;;  %v427_v16 = vld [vmem:[#allocation8 + $0x8] sm:$0xff] }
 0x132   :  { %v428_v18 = vld [vmem:[#allocation8 + $0x10] sm:$0xff] }
 0x133   :  { %195 = vadd.xlane.f32.xlu0 %v194_v17 }
 0x134   :  { %v334_v62 = vpop.f32.mrb[2].mxu0 }
 0x135   :  { %v336_v63 = vpop.f32.mrb[3].mxu0 }
 0x1c0   :  { %v196_v21 = vpop.xlane.xlu0 %195 }
 0x1c1   :  { %v197_v22 = vmul.f32 0.03125, %v196_v21  ;;  %v1108_v21 = vpack.c.bf16 %v429_v20, %v428_v18 }
 0x1c3   :  { %v1488_v23 = vsub.f32 %v194_v17, %v197_v22  ;;  %v1105_v17 = vpack.c.bf16 %v427_v16, %v426_v15  ;;  %v430_v22 = vld [vmem:[#allocation8 + $0x20] sm:$0xff]  ;;  %v414_v15 = vsub.s32 0, %v413_v14 }
 0x1c4   :  { %v410_v16 = vld [vmem:[%s1575_s6] sm:$0x3] }
 0x1c5   :  { %v202_v24 = vsel %vm201_vm2, %v1488_v23, 0.0  ;;  %1106 = vmatpush3.bf16.msra.mxu0 %v1105_v17  ;;  %v418_v17 = vsub.s32 1, %v413_v14  ;;  %v415_v18 = vrot.slane %v410_v16, %v414_v15  ;;  %v822_v14 = vld [vmem:[%s1577_s8 + $0x1] ss:$0 sm:$0xff] }
 0x1c6   :  { %v203_v25 = vmul.f32 %v202_v24, %v202_v24  ;;  %1107 = vmatprep.subr.bf16.mxu0 %v1345_v0  ;;  %v431_v24 = vld [vmem:[#allocation8 + $0x28] sm:$0xff] }
 0x1c8   :  { %204 = vadd.xlane.f32.xlu0 %v203_v25  ;;  %v1111_v25 = vpack.c.bf16 %v431_v24, %v430_v22 }
 0x1c9   :  { %1109 = vmatpush3.bf16.msra.mxu0 %v1108_v21  ;;  %v419_v21 = vrot.slane %v410_v16, %v418_v17 }
 0x1ca   :  { %1110 = vmatprep.subr.bf16.mxu0 %v1345_v0 }
 0x1cd   :  { %1112 = vmatpush3.bf16.msra.mxu0 %v1111_v25  ;;  %v632_v25 = vld [vmem:[#allocation9 + $0x80] sm:$0xff] }
 0x1ce   :  { %1113 = vmatprep.subr.bf16.mxu0 %v1345_v0  ;;  %v1153_v32 = vpack.c.bf16 %v633_v26, %v632_v25  ;;  %v823_v26 = vld [vmem:[%s1579_s10] ss:$0 sm:$0xff] }
 0x1d1   :  { %1115 = vmatpush3.bf16.msra.mxu0 %v1114_v28  ;;  %v615_v28 = vld [vmem:[#allocation9] sm:$0xff] }
 0x1d2   :  { %1116 = vmatprep.subr.bf16.mxu0 %v1345_v0  ;;  %v1177_v33 = vpack.c.bf16 %v616_v29, %v615_v28 }
 0x1d5   :  { %1118 = vmatpush3.bf16.msra.mxu0 %v1117_v31 }
 0x1d6   :  { %1119 = vmatprep.subr.bf16.mxu0 %v1345_v0 }
 0x1d9   :  { %1121 = vmatpush3.bf16.msra.mxu0 %v1120_v34  ;;  %v634_v34 = vld [vmem:[#allocation9 + $0x90] sm:$0xff] }
 0x1da   :  { %1122 = vmatprep.subr.bf16.mxu0 %v1345_v0 }
 0x1dd   :  { %1124 = vmatpush3.bf16.msra.mxu0 %v1123_v4  ;;  %v628_v4 = vld [vmem:[#allocation9 + $0x68] sm:$0xff] }
 0x1de   :  { %1125 = vmatprep.subr.bf16.mxu0 %v1345_v0  ;;  %v1195_v6 = vpack.c.bf16 %v628_v4, %v627_v3 }
 0x1e1   :  { %1127 = vmatpush3.bf16.msra.mxu0 %v1126_v10  ;;  %v646_v10 = vld [vmem:[#allocation9 + $0xf0] sm:$0xff] }
 0x1e2   :  { %1152 = vmatprep.subr.bf16.mxu0 %v1345_v0  ;;  %v1174_v12 = vpack.c.bf16 %v647_v11, %v646_v10 }
 0x255   :  { %v205_v35 = vpop.xlane.xlu0 %204 }
 0x256   :  { %v206_v36 = vmul.f32 0.03125, %v205_v35  ;;  %v635_v35 = vld [vmem:[#allocation9 + $0x98] sm:$0xff] }
 0x258   :  { %v207_v37 = vadd.f32 1e-05, %v206_v36 }
 0x25a   :  { %1215 = vrsqrt.f32 %v207_v37  ;;  %v617_v37 = vld [vmem:[#allocation9 + $0x10] sm:$0xff] }
 0x264   :  { %v1216_v38 = vpop.eup %1215 }
 0x265   :  { %v209_v40 = vmul.f32 %v1216_v38, %v1488_v23  ;;  %v525_v23 = vld [vmem:[#allocation8 + $0xa0] sm:$0xff]  ;;  %v618_v38 = vld [vmem:[#allocation9 + $0x18] sm:$0xff] }
 0x266   :  { %v1135_v52 = vpack.c.bf16 %v526_v51, %v525_v23  ;;  %v1162_v23 = vpack.c.bf16 %v639_v48, %v638_v47 }
 0x267   :  { %v215_v42 = vmul.f32 %v816_v39, %v209_v40  ;;  %v1156_v39 = vpack.c.bf16 %v635_v35, %v634_v34  ;;  %v1180_v40 = vpack.c.bf16 %v618_v38, %v617_v37 }
 0x269   :  { %v221_v43 = vadd.f32 %v817_v41, %v215_v42  ;;  %v636_v41 = vld [vmem:[#allocation9 + $0xa0] sm:$0xff]  ;;  %v637_v42 = vld [vmem:[#allocation9 + $0xa8] sm:$0xff] }
 0x26a   :  { %v1159_v45 = vpack.c.bf16 %v637_v42, %v636_v41 }
 0x26b   :  { %1217 = vtanh.f32 %v221_v43  ;;  %v619_v43 = vld [vmem:[#allocation9 + $0x20] sm:$0xff] }
 0x275   :  { %v1218_v49 = vpop.eup %1217 }
 0x276   :  { %404 = vmatmul.mubr.f32.vlgmr.msra.gmra.mrb[0].mxu1 %v1218_v49  ;;  %v621_v49 = vld [vmem:[#allocation9 + $0x30] sm:$0xff] }
 0x277   :  { %1130 = vmatpush3.bf16.msra.mxu1 %v1129_v46  ;;  %987 = vmatprep.mubr.msk.f32.mxu1 %vm1346_vm0, %v1347_v1  ;;  %v1183_v46 = vpack.c.bf16 %v620_v44, %v619_v43 }
 0x278   :  { %1131 = vmatprep.subr.bf16.mxu1 %v1345_v0 }
 0x27b   :  { %1133 = vmatpush3.bf16.msra.mxu1 %v1132_v50  ;;  %v622_v50 = vld [vmem:[#allocation9 + $0x38] sm:$0xff] }
 0x27c   :  { %1134 = vmatprep.subr.bf16.mxu1 %v1345_v0  ;;  %v1186_v51 = vpack.c.bf16 %v622_v50, %v621_v49 }
 0x27f   :  { %1136 = vmatpush3.bf16.msra.mxu1 %v1135_v52  ;;  %v640_v52 = vld [vmem:[#allocation9 + $0xc0] sm:$0xff] }
 0x280   :  { %1137 = vmatprep.subr.bf16.mxu1 %v1345_v0 }
 0x283   :  { %1139 = vmatpush3.bf16.msra.mxu1 %v1138_v55 }
 0x284   :  { %1140 = vmatprep.subr.bf16.mxu1 %v1345_v0 }
 0x287   :  { %1142 = vmatpush3.bf16.msra.mxu1 %v1141_v58  ;;  %v643_v58 = vld [vmem:[#allocation9 + $0xd8] sm:$0xff] }
 0x288   :  { %1143 = vmatprep.subr.bf16.mxu1 %v1345_v0 }
 0x28b   :  { %1145 = vmatpush3.bf16.msra.mxu1 %v1144_v61  ;;  %v1168_v61 = vpack.c.bf16 %v643_v58, %v642_v57 }
 0x28c   :  { %1146 = vmatprep.subr.bf16.mxu1 %v1345_v0 }
 0x28f   :  { %1148 = vmatpush3.bf16.msra.mxu1 %v1147_v7  ;;  %v629_v7 = vld [vmem:[#allocation9 + $0x70] sm:$0xff] }
 0x290   :  { %1149 = vmatprep.subr.bf16.mxu1 %v1345_v0  ;;  %v1198_v9 = vpack.c.bf16 %v630_v8, %v629_v7 }
 0x293   :  { %1151 = vmatpush3.bf16.msra.mxu1 %v1150_v13  ;;  %v821_v13 = vld [vmem:[%s1577_s8] ss:$0 sm:$0xff]  ;;  %s1307_s8 = scalar_lea.vmem %s804_s23, 128 }
 0x294   :  { %1176 = vmatprep.subr.bf16.mxu1 %v1345_v0  ;;  %p1308_p4 = scmp.ne.s32.totalorder %s804_s23, %s1307_s8  ;;  %p1313_p6 = scmp.lt.s32.totalorder %s1307_s8, %s1307_s8 }
 0x296   :  { %p1314_p7 = por %p1313_p6, %p1312_p5 }
 0x298   :  { %p1315_p8 = pnand %p1314_p7, %p1308_p4 }
 0x349   :  { %v405_v20 = vpop.f32.mrb[0].mxu1 }
 0x34a   :  { %v406_v22 = vadd.f32 %v405_v20, %v334_v62  ;;  %v407_v24 = vpop.f32.mrb[1].mxu1  ;;  %v1192_v62 = vpack.c.bf16 %v626_v60, %v625_v59 }
 0x34b   :  { %v408_v27 = vadd.f32 %v407_v24, %v336_v63  ;;  %v644_v63 = vld [vmem:[#allocation9 + $0xe0] sm:$0xff] }
 0x34c   :  { %v422_v30 = vadd.f32 %v415_v18, %v406_v22  ;;  %v1171_v5 = vpack.c.bf16 %v645_v2, %v644_v63 }
 0x34d   :  { %v423_v31 = vadd.f32 %v419_v21, %v408_v27 }
 0x34e   :  { %v424_v19 = vmax.f32 %v422_v30, 0.0 }
 0x34f   :  { %v425_v36 = vmax.f32 %v423_v31, 0.0 }
 0x350   :  { %953 = vmatmul.mubr.f32.vlgmr.msra.gmra.mrb[4].mxu0 %v424_v19 }
 0x351   :  { %988 = vmatmul.mubr.f32.vlgmr.msra.gmra.mrb[2].mxu1 %v425_v36  ;;  %1154 = vmatpush3.bf16.msra.mxu0 %v1153_v32 }
 0x352   :  { %1178 = vmatpush3.bf16.msra.mxu1 %v1177_v33  ;;  %1155 = vmatprep.subr.bf16.mxu0 %v1345_v0 }
 0x353   :  { %1179 = vmatprep.subr.bf16.mxu1 %v1345_v0  ;;  %1057 = vmatprep.mubr.msk.f32.mxu1 %vm1346_vm0, %v1347_v1 }
 0x354   :  { %1022 = vmatprep.mubr.msk.f32.mxu0 %vm1346_vm0, %v1347_v1  ;;  %v641_v1 = vld [vmem:[#allocation9 + $0xc8] sm:$0xff] }
 0x355   :  { %1157 = vmatpush3.bf16.msra.mxu0 %v1156_v39  ;;  %v1165_v55 = vpack.c.bf16 %v641_v1, %v640_v52 }
 0x356   :  { %1181 = vmatpush3.bf16.msra.mxu1 %v1180_v40  ;;  %1158 = vmatprep.subr.bf16.mxu0 %v1345_v0 }
 0x357   :  { %1182 = vmatprep.subr.bf16.mxu1 %v1345_v0 }
 0x359   :  { %1160 = vmatpush3.bf16.msra.mxu0 %v1159_v45 }
 0x35a   :  { %1184 = vmatpush3.bf16.msra.mxu1 %v1183_v46  ;;  %1161 = vmatprep.subr.bf16.mxu0 %v1345_v0 }
 0x35b   :  { %1185 = vmatprep.subr.bf16.mxu1 %v1345_v0 }
 0x35d   :  { %1163 = vmatpush3.bf16.msra.mxu0 %v1162_v23 }
 0x35e   :  { %1187 = vmatpush3.bf16.msra.mxu1 %v1186_v51  ;;  %1164 = vmatprep.subr.bf16.mxu0 %v1345_v0 }
 0x35f   :  { %1188 = vmatprep.subr.bf16.mxu1 %v1345_v0 }
 0x361   :  { %1166 = vmatpush3.bf16.msra.mxu0 %v1165_v55 }
 0x362   :  { %1190 = vmatpush3.bf16.msra.mxu1 %v1189_v56  ;;  %1167 = vmatprep.subr.bf16.mxu0 %v1345_v0 }
 0x363   :  { %1191 = vmatprep.subr.bf16.mxu1 %v1345_v0 }
 0x365   :  { %1169 = vmatpush3.bf16.msra.mxu0 %v1168_v61 }
 0x366   :  { %1193 = vmatpush3.bf16.msra.mxu1 %v1192_v62  ;;  %1170 = vmatprep.subr.bf16.mxu0 %v1345_v0 }
 0x367   :  { %1194 = vmatprep.subr.bf16.mxu1 %v1345_v0 }
 0x369   :  { %1172 = vmatpush3.bf16.msra.mxu0 %v1171_v5 }
 0x36a   :  { %1196 = vmatpush3.bf16.msra.mxu1 %v1195_v6  ;;  %1173 = vmatprep.subr.bf16.mxu0 %v1345_v0 }
 0x36b   :  { %1197 = vmatprep.subr.bf16.mxu1 %v1345_v0 }
 0x36d   :  { %1175 = vmatpush3.bf16.msra.mxu0 %v1174_v12 }
 0x36e   :  { %1199 = vmatpush3.bf16.msra.mxu1 %v1198_v9 }
 0x423   :  { %v515_v15 = vpop.f32.mrb[4].mxu0 }
 0x424   :  { %v516_v16 = vadd.f32 %v821_v13, %v515_v15  ;;  %v954_v17 = vpop.f32.mrb[5].mxu0  ;;  %v610_v0 = vpop.f32.mrb[2].mxu1 }
 0x425   :  { %v611_v18 = vadd.f32 %v822_v14, %v610_v0  ;;  %v989_v20 = vpop.f32.mrb[3].mxu1 }
 0x426   :  { %v519_v21 = vmax.f32 %v516_v16, 0.0 }
 0x427   :  { %v614_v22 = vmax.f32 %v611_v18, 0.0 }
 0x428   :  { %1058 = vmatmul.mubr.f32.vlgmr.msra.gmra.mrb[4].mxu1 %v519_v21 }
 0x429   :  { %1023 = vmatmul.mubr.f32.vlgmr.msra.gmra.mrb[6].mxu0 %v614_v22 }
 0x4fb   :  { %v784_v24 = vpop.f32.mrb[4].mxu1 }
 0x4fc   :  { %v714_v25 = vpop.f32.mrb[6].mxu0  ;;  %v1059_v27 = vpop.f32.mrb[5].mxu1 }
 0x4fd   :  { %v785_v28 = vadd.f32 %v784_v24, %v714_v25  ;;  %v1024_v29 = vpop.f32.mrb[7].mxu0 }
 0x4ff   :  { %v795_v30 = vadd.f32 %v823_v26, %v785_v28 }
 0x501   :  { %796 = vst [vmem:[#allocation11] sm:$0xff] %v795_v30 }
 0x502   :  { %1318 = shalt.err (!%p1315_p8)
}
 0x503   :  { %s1319_s27 = scalar_lea.hbm %s1580_s11, 128 }
 0x504   :  { %p1320_p9 = scmp.ne.s32.totalorder %s1580_s11, %s1319_s27  ;;  %p1323_p10 = scmp.lt.u32.totalorder %s1319_s27, %s1580_s11 }
 0x506   :  { %p1325_p11 = pnand %p1323_p10, %p1320_p9 }
 0x508   :  { %1328 = shalt.err (!%p1325_p11)
}
 0x509   :  { %806 = dma.vmem_to_hbm [thread:$0]  %s804_s23, 128, %s1580_s11, [#allocation5]  }
 0x50a   :  { %1335 = dma.done.wait [#allocation5], 128  }
 0x50b   :  { %1336 = vsyncadd [#allocation5], 4294967168 }
 0x50c   :  { %810 = vsyncpa [#allocation4], 1 }
 0x50d   :  { %811 = vsyncpa [#allocation7], 1 }
 0x50e   :  { %812 = vsyncpa [#allocation10], 1 }
 0x50f   :  { %813 = vsyncpa [#allocation5], 1 }

// kernel: tpu_custom_call.1
= control target key start
LH: loop header
LB: loop body
LE: loop exit
PB: predicated region body
PF: predicated region fallthrough
CT: control target
= control target key end

     0   :  { %16 = vsyncpa [#allocation4], 0  ;;  %s1569_s0 = inlined_call_operand.vmem [shape: f32[8,64], index: 0, kind: input, shape index: {}]   ;;  %s1570_s1 = inlined_call_operand.vmem [shape: f32[8,4], index: 1, kind: input, shape index: {}]   ;;  %s1571_s2 = inlined_call_operand.hbm [shape: f32[64,128], index: 2, kind: input, shape index: {}]   ;;  %s1572_s3 = inlined_call_operand.vmem [shape: f32[3,128], index: 3, kind: input, shape index: {}]   ;;  %s1573_s4 = inlined_call_operand.hbm [shape: f32[128,256], index: 4, kind: input, shape index: {}]   ;;  %s1574_s5 = inlined_call_operand.vmem [shape: f32[4,256], index: 5, kind: input, shape index: {}]   ;;  %s1575_s6 = inlined_call_operand.vmem [shape: f32[1,256], index: 6, kind: input, shape index: {}]   ;;  %s1576_s7 = inlined_call_operand.hbm [shape: f32[2,128,128], index: 7, kind: input, shape index: {}]   ;;  %s1577_s8 = inlined_call_operand.vmem [shape: f32[1,256], index: 8, kind: input, shape index: {}]   ;;  %s1578_s9 = inlined_call_operand.hbm [shape: f32[2,128,128], index: 9, kind: input, shape index: {}]   ;;  %s1579_s10 = inlined_call_operand.vmem [shape: f32[1,128], index: 10, kind: input, shape index: {}]   ;;  %s1580_s11 = inlined_call_operand.hbm [shape: f32[8,128], index: 11, kind: output, shape index: {}]  }
   0x1   :  { %17 = vsyncpa [#allocation7], 0 }
   0x2   :  { %18 = vsyncpa [#allocation10], 0 }
   0x3   :  { %19 = vsyncpa [#allocation5], 0  ;;  %s1337_s17 = smov [#allocation6]   ;;  %s1219_s21 = scalar_lea.hbm %s1573_s4, 4096 }
   0x4   :  { %s43_s18 = sshll.u32 %s1337_s17, 4  ;;  %p1220_p0 = scmp.ne.s32.totalorder %s1573_s4, %s1219_s21  ;;  %s44_s18 = int_to_ptr.vmem [resolvable:$true] %s43_s18 }
   0x5   :  { %p1223_p1 = scmp.lt.u32.totalorder %s1219_s21, %s1573_s4 }
   0x7   :  { %p1225_p2 = pnand %p1223_p1, %p1220_p0 }
   0x9   :  { %1228 = shalt.err (!%p1225_p2)
}
   0xa   :  { %s1229_s26 = scalar_lea.vmem %s44_s18, 4096  ;;  %p1234_p4 = scmp.lt.s32.totalorder %s44_s18, %s44_s18 }
   0xb   :  { %p1230_p3 = scmp.ne.s32.totalorder %s44_s18, %s1229_s26  ;;  %p1235_p5 = scmp.lt.s32.totalorder %s1229_s26, %s1229_s26 }
   0xd   :  { %p1236_p6 = por %p1235_p5, %p1234_p4 }
   0xf   :  { %p1237_p7 = pnand %p1236_p6, %p1230_p3 }
  0x11   :  { %1240 = shalt.err (!%p1237_p7)
}
  0x12   :  { %s1338_s27 = smov 256   ;;  %s1339_s28 = smov 16  }
  0x13   :  { %49 = dma.hbm_to_vmem [thread:$0]  %s1573_s4, 4096, %s44_s18, [#allocation7], %s1338_s27, %s1338_s27, %s1339_s28  }
  0x14   :  { %s1340_s12 = smov [#allocation3]   ;;  %s1241_s16 = scalar_lea.hbm %s1571_s2, 1024 }
  0x15   :  { %s29_s13 = sshll.u32 %s1340_s12, 4  ;;  %p1242_p8 = scmp.ne.s32.totalorder %s1571_s2, %s1241_s16  ;;  %s30_s13 = int_to_ptr.vmem [resolvable:$true] %s29_s13 }
  0x16   :  { %p1245_p9 = scmp.lt.u32.totalorder %s1241_s16, %s1571_s2 }
  0x18   :  { %p1247_p10 = pnand %p1245_p9, %p1242_p8 }
  0x1a   :  { %1250 = shalt.err (!%p1247_p10)
}
  0x1b   :  { %s1251_s22 = scalar_lea.vmem %s30_s13, 1024  ;;  %p1256_p12 = scmp.lt.s32.totalorder %s30_s13, %s30_s13 }
  0x1c   :  { %p1252_p11 = scmp.ne.s32.totalorder %s30_s13, %s1251_s22  ;;  %p1257_p13 = scmp.lt.s32.totalorder %s1251_s22, %s1251_s22 }
  0x1e   :  { %p1258_p0 = por %p1257_p13, %p1256_p12 }
  0x20   :  { %p1259_p1 = pnand %p1258_p0, %p1252_p11 }
  0x22   :  { %1262 = shalt.err (!%p1259_p1)
}
  0x23   :  { %s1341_s4 = smov 128   ;;  %s1342_s18 = smov 8  }
  0x24   :  { %35 = dma.hbm_to_vmem [thread:$0]  %s1571_s2, 1024, %s30_s13, [#allocation4], %s1341_s4, %s1341_s4, %s1342_s18  }
  0x25   :  { %s1343_s25 = smov [#allocation8]   ;;  %s1344_s27 = smov [#allocation9]  }
  0x26   :  { %s59_s26 = sshll.u32 %s1343_s25, 4  ;;  %s73_s28 = sshll.u32 %s1344_s27, 4  ;;  %s60_s26 = int_to_ptr.vmem [resolvable:$true] %s59_s26  ;;  %s1436_s28 = int_to_ptr.vmem [resolvable:$true] %s73_s28 }
  0x27   :  { %s1263_s12 = scalar_lea.hbm %s1576_s7, 4096 }
  0x28   :  { %p1264_p2 = scmp.ne.s32.totalorder %s1576_s7, %s1263_s12  ;;  %p1267_p3 = scmp.lt.u32.totalorder %s1263_s12, %s1576_s7 }
  0x2a   :  { %p1269_p4 = pnand %p1267_p3, %p1264_p2 }
  0x2c   :  { %1272 = shalt.err (!%p1269_p4)
}
  0x2d   :  { %s1273_s2 = scalar_lea.vmem %s60_s26, 4096  ;;  %p1278_p6 = scmp.lt.s32.totalorder %s60_s26, %s60_s26 }
  0x2e   :  { %p1274_p5 = scmp.ne.s32.totalorder %s60_s26, %s1273_s2  ;;  %p1279_p7 = scmp.lt.s32.totalorder %s1273_s2, %s1273_s2 }
  0x30   :  { %p1280_p8 = por %p1279_p7, %p1278_p6 }
  0x32   :  { %p1281_p9 = pnand %p1280_p8, %p1274_p5 }
  0x34   :  { %1284 = shalt.err (!%p1281_p9)
}
  0x35   :  { %65 = dma.hbm_to_vmem [thread:$0]  %s1576_s7, 4096, %s60_s26, [#allocation7], %s1341_s4, %s1341_s4, %s1342_s18  }
  0x36   :  { %s1285_s22 = scalar_lea.hbm %s1578_s9, 4096 }
  0x37   :  { %p1286_p10 = scmp.ne.s32.totalorder %s1578_s9, %s1285_s22  ;;  %p1289_p11 = scmp.lt.u32.totalorder %s1285_s22, %s1578_s9 }
  0x39   :  { %p1291_p12 = pnand %p1289_p11, %p1286_p10 }
  0x3b   :  { %1294 = shalt.err (!%p1291_p12)
}
  0x3c   :  { %s1295_s29 = scalar_lea.vmem %s1436_s28, 4096  ;;  %p1300_p0 = scmp.lt.s32.totalorder %s1436_s28, %s1436_s28 }
  0x3d   :  { %p1296_p13 = scmp.ne.s32.totalorder %s1436_s28, %s1295_s29  ;;  %p1301_p1 = scmp.lt.s32.totalorder %s1295_s29, %s1295_s29 }
  0x3f   :  { %p1302_p2 = por %p1301_p1, %p1300_p0 }
  0x41   :  { %p1303_p3 = pnand %p1302_p2, %p1296_p13 }
  0x43   :  { %1306 = shalt.err (!%p1303_p3)
}
  0x44   :  { %79 = dma.hbm_to_vmem [thread:$0]  %s1578_s9, 4096, %s1436_s28, [#allocation10], %s1341_s4, %s1341_s4, %s1342_s18  }
  0x45   :  { %1329 = dma.done.wait [#allocation4], 1024  }
  0x46   :  { %1330 = vsyncadd [#allocation4], 4294966272 }
  0x47   :  { %1331 = dma.done.wait [#allocation7], 8192  }
  0x48   :  { %1332 = vsyncadd [#allocation7], 4294959104 }
  0x49   :  { %1333 = dma.done.wait [#allocation10], 4096  }
  0x4a   :  { %1334 = vsyncadd [#allocation10], 4294963200  ;;  %v1345_v0 = vmov 0.0|0.0   ;;  %vm1346_vm0 = vmmov 0   ;;  %v1347_v1 = vmov 0.0   ;;  %v101_v2 = vld [vmem:[#allocation3] sm:$0xff]  ;;  %v199_v19 = vlaneseq }
  0x4b   :  { %1060 = vmatprep.subr.bf16.mxu0 %v1345_v0  ;;  %917 = vmatprep.mubr.msk.f32.mxu0 %vm1346_vm0, %v1347_v1  ;;  %v102_v3 = vld [vmem:[#allocation3 + $0x8] sm:$0xff]  ;;  %v103_v4 = vld [vmem:[#allocation3 + $0x10] sm:$0xff]  ;;  %v104_v6 = vld [vmem:[#allocation3 + $0x18] sm:$0xff]  ;;  %vm109_vm1 = vcmask 523264   ;;  %vm263_vm3 = vcmask 1043456   ;;  %vm259_vm4 = vcmask 31744  }
  0x4c   :  { %403 = vmatprep.mubr.f32.mxu1 %v1347_v1  ;;  %v1061_v5 = vpack.c.bf16 %v102_v3, %v101_v2  ;;  %v1064_v7 = vpack.c.bf16 %v104_v6, %v103_v4  ;;  %v105_v8 = vld [vmem:[#allocation3 + $0x20] sm:$0xff]  ;;  %v106_v9 = vld [vmem:[#allocation3 + $0x28] sm:$0xff]  ;;  %v107_v11 = vld [vmem:[#allocation3 + $0x30] sm:$0xff]  ;;  %v200_v20 = vand.u32 127, %v199_v19  ;;  %s1348_s22 = smov [#allocation11]  }
  0x4d   :  { %v1067_v10 = vpack.c.bf16 %v106_v9, %v105_v8  ;;  %v108_v12 = vld [vmem:[#allocation3 + $0x38] sm:$0xff]  ;;  %v99_v14 = vld [vmem:[%s1569_s0] sm:$0xff]  ;;  %v225_v26 = vld [vmem:[#allocation6 + $0x8] sm:$0xff]  ;;  %s803_s23 = sshll.u32 %s1348_s22, 4  ;;  %s804_s23 = int_to_ptr.vmem [resolvable:$true] %s803_s23 }
  0x4e   :  { %1062 = vmatpush3.bf16.msra.mxu0 %v1061_v5  ;;  %v1070_v13 = vpack.c.bf16 %v108_v12, %v107_v11  ;;  %v815_v15 = vld [vmem:[%s1572_s3] ss:$0 sm:$0xff]  ;;  %vm201_vm2 = vcmp.lt.s32.totalorder %v200_v20, 32  ;;  %v227_v27 = vld [vmem:[#allocation6 + $0x18] sm:$0xff]  ;;  %v226_v30 = vld [vmem:[#allocation6 + $0x10] sm:$0xff]  ;;  %p1312_p5 = scmp.lt.s32.totalorder %s804_s23, %s804_s23 }
  0x4f   :  { %1063 = vmatprep.subr.bf16.mxu0 %v1345_v0  ;;  %v1072_v28 = vpack.c.bf16 %v227_v27, %v225_v26  ;;  %v224_v29 = vld [vmem:[#allocation6] sm:$0xff]  ;;  %v229_v32 = vld [vmem:[#allocation6 + $0x28] sm:$0xff]  ;;  %v231_v33 = vld [vmem:[#allocation6 + $0x38] sm:$0xff] }
  0x50   :  { %v1074_v31 = vpack.c.bf16 %v226_v30, %v224_v29  ;;  %v1076_v34 = vpack.c.bf16 %v231_v33, %v229_v32  ;;  %v228_v35 = vld [vmem:[#allocation6 + $0x20] sm:$0xff]  ;;  %v230_v36 = vld [vmem:[#allocation6 + $0x30] sm:$0xff]  ;;  %v233_v38 = vld [vmem:[#allocation6 + $0x48] sm:$0xff] }
  0x51   :  { %1073 = vmatprep.subr.bf16.mxu1 %v1072_v28  ;;  %v1078_v37 = vpack.c.bf16 %v230_v36, %v228_v35  ;;  %v235_v39 = vld [vmem:[#allocation6 + $0x58] sm:$0xff]  ;;  %v232_v41 = vld [vmem:[#allocation6 + $0x40] sm:$0xff]  ;;  %v234_v42 = vld [vmem:[#allocation6 + $0x50] sm:$0xff] }
  0x52   :  { %1065 = vmatpush3.bf16.msra.mxu0 %v1064_v7  ;;  %1075 = vmatpush1.bf16.msra.mxu1 %v1074_v31  ;;  %v1080_v40 = vpack.c.bf16 %v235_v39, %v233_v38  ;;  %v1082_v43 = vpack.c.bf16 %v234_v42, %v232_v41  ;;  %v237_v44 = vld [vmem:[#allocation6 + $0x68] sm:$0xff]  ;;  %v239_v45 = vld [vmem:[#allocation6 + $0x78] sm:$0xff]  ;;  %v236_v47 = vld [vmem:[#allocation6 + $0x60] sm:$0xff] }
  0x53   :  { %1066 = vmatprep.subr.bf16.mxu0 %v1345_v0  ;;  %1077 = vmatprep.subr.bf16.mxu1 %v1076_v34  ;;  %v1084_v46 = vpack.c.bf16 %v239_v45, %v237_v44  ;;  %v238_v48 = vld [vmem:[#allocation6 + $0x70] sm:$0xff]  ;;  %v241_v50 = vld [vmem:[#allocation6 + $0x88] sm:$0xff]  ;;  %v243_v51 = vld [vmem:[#allocation6 + $0x98] sm:$0xff] }
  0x54   :  { %v1086_v49 = vpack.c.bf16 %v238_v48, %v236_v47  ;;  %v1088_v52 = vpack.c.bf16 %v243_v51, %v241_v50  ;;  %v240_v53 = vld [vmem:[#allocation6 + $0x80] sm:$0xff]  ;;  %v242_v54 = vld [vmem:[#allocation6 + $0x90] sm:$0xff]  ;;  %v245_v56 = vld [vmem:[#allocation6 + $0xa8] sm:$0xff] }
  0x55   :  { %v1090_v55 = vpack.c.bf16 %v242_v54, %v240_v53  ;;  %v247_v57 = vld [vmem:[#allocation6 + $0xb8] sm:$0xff]  ;;  %v244_v59 = vld [vmem:[#allocation6 + $0xa0] sm:$0xff]  ;;  %v246_v60 = vld [vmem:[#allocation6 + $0xb0] sm:$0xff] }
  0x56   :  { %1068 = vmatpush3.bf16.msra.mxu0 %v1067_v10  ;;  %1079 = vmatpush1.bf16.msra.mxu1 %v1078_v37  ;;  %v1092_v58 = vpack.c.bf16 %v247_v57, %v245_v56  ;;  %v1094_v61 = vpack.c.bf16 %v246_v60, %v244_v59  ;;  %v249_v62 = vld [vmem:[#allocation6 + $0xc8] sm:$0xff]  ;;  %v251_v63 = vld [vmem:[#allocation6 + $0xd8] sm:$0xff]  ;;  %v248_v2 = vld [vmem:[#allocation6 + $0xc0] sm:$0xff] }
  0x57   :  { %1069 = vmatprep.subr.bf16.mxu0 %v1345_v0  ;;  %1081 = vmatprep.subr.bf16.mxu1 %v1080_v40  ;;  %v1096_v3 = vpack.c.bf16 %v251_v63, %v249_v62  ;;  %v250_v4 = vld [vmem:[#allocation6 + $0xd0] sm:$0xff]  ;;  %v256_v5 = vld [vmem:[%s1574_s5] sm:$0xff]  ;;  %v253_v6 = vld [vmem:[#allocation6 + $0xe8] sm:$0xff] }
  0x58   :  { %v1098_v7 = vpack.c.bf16 %v250_v4, %v248_v2  ;;  %v258_v8 = vcombine.high %v256_v5, %v256_v5  ;;  %v255_v9 = vld [vmem:[#allocation6 + $0xf8] sm:$0xff]  ;;  %v252_v10 = vld [vmem:[#allocation6 + $0xe0] sm:$0xff]  ;;  %v254_v11 = vld [vmem:[#allocation6 + $0xf0] sm:$0xff] }
  0x59   :  { %v1100_v12 = vpack.c.bf16 %v255_v9, %v253_v6  ;;  %v429_v20 = vld [vmem:[#allocation8 + $0x18] sm:$0xff]  ;;  %v432_v26 = vld [vmem:[#allocation8 + $0x30] sm:$0xff]  ;;  %v434_v29 = vld [vmem:[#allocation8 + $0x40] sm:$0xff] }
  0x5a   :  { %1071 = vmatpush3.bf16.msra.mxu0 %v1070_v13  ;;  %1083 = vmatpush1.bf16.msra.mxu1 %v1082_v43  ;;  %v223_v13 = vld [vmem:[%s1570_s1] sm:$0xff]  ;;  %v433_v27 = vld [vmem:[#allocation8 + $0x38] sm:$0xff]  ;;  %v435_v30 = vld [vmem:[#allocation8 + $0x48] sm:$0xff] }
  0x5b   :  { %1085 = vmatprep.subr.bf16.mxu1 %v1084_v46  ;;  %818 = vmatprep.subr.msk.mxu0 %vm263_vm3, %v258_v8  ;;  %v1114_v28 = vpack.c.bf16 %v433_v27, %v432_v26  ;;  %v1117_v31 = vpack.c.bf16 %v435_v30, %v434_v29  ;;  %v436_v32 = vld [vmem:[#allocation8 + $0x50] sm:$0xff]  ;;  %v437_v33 = vld [vmem:[#allocation8 + $0x58] sm:$0xff]  ;;  %v816_v39 = vld [vmem:[%s1572_s3 + $0x1] ss:$0 sm:$0xff] }
  0x5c   :  { %v1120_v34 = vpack.c.bf16 %v437_v33, %v436_v32  ;;  %v817_v41 = vld [vmem:[%s1572_s3 + $0x2] ss:$0 sm:$0xff]  ;;  %v522_v45 = vld [vmem:[#allocation8 + $0x88] sm:$0xff]  ;;  %v523_v47 = vld [vmem:[#allocation8 + $0x90] sm:$0xff] }
  0x5d   :  { %918 = vmatmul.mubr.msk.f32.vlgmr.msra.gmra.mrb[0].mxu0 %vm109_vm1, %v99_v14  ;;  %v1102_v14 = vpack.c.bf16 %v254_v11, %v252_v10  ;;  %v521_v44 = vld [vmem:[#allocation8 + $0x80] sm:$0xff]  ;;  %v524_v48 = vld [vmem:[#allocation8 + $0x98] sm:$0xff]  ;;  %v526_v51 = vld [vmem:[#allocation8 + $0xa8] sm:$0xff] }
  0x5e   :  { %332 = vmatprep.mubr.f32.mxu0 %v1347_v1  ;;  %1087 = vmatpush1.bf16.msra.mxu1 %v1086_v49  ;;  %v1129_v46 = vpack.c.bf16 %v522_v45, %v521_v44  ;;  %v1132_v50 = vpack.c.bf16 %v524_v48, %v523_v47  ;;  %v527_v53 = vld [vmem:[#allocation8 + $0xb0] sm:$0xff]  ;;  %v528_v54 = vld [vmem:[#allocation8 + $0xb8] sm:$0xff]  ;;  %v529_v56 = vld [vmem:[#allocation8 + $0xc0] sm:$0xff] }
  0x5f   :  { %1089 = vmatprep.subr.bf16.mxu1 %v1088_v52  ;;  %819 = vmatpush1.msk.msra.mxu0 %vm263_vm3, %v256_v5  ;;  %v530_v57 = vld [vmem:[#allocation8 + $0xc8] sm:$0xff]  ;;  %v531_v59 = vld [vmem:[#allocation8 + $0xd0] sm:$0xff]  ;;  %v532_v60 = vld [vmem:[#allocation8 + $0xd8] sm:$0xff] }
  0x60   :  { %1104 = vmatprep.subr.bf16.mxu0 %v1345_v0  ;;  %v438_v2 = vld [vmem:[#allocation8 + $0x60] sm:$0xff]  ;;  %v534_v6 = vld [vmem:[#allocation8 + $0xe8] sm:$0xff]  ;;  %v440_v8 = vld [vmem:[#allocation8 + $0x70] sm:$0xff] }
  0x61   :  { %820 = vmatmul.mubr.msk.f32.vlgmr.msra.gmra.mrb[2].mxu0 %vm259_vm4, %v223_v13  ;;  %v533_v5 = vld [vmem:[#allocation8 + $0xe0] sm:$0xff]  ;;  %v441_v9 = vld [vmem:[#allocation8 + $0x78] sm:$0xff]  ;;  %v535_v11 = vld [vmem:[#allocation8 + $0xf0] sm:$0xff] }
  0x62   :  { %1091 = vmatpush1.bf16.msra.mxu1 %v1090_v55  ;;  %952 = vmatprep.mubr.msk.f32.mxu0 %vm1346_vm0, %v1347_v1  ;;  %v1138_v55 = vpack.c.bf16 %v528_v54, %v527_v53  ;;  %v1126_v10 = vpack.c.bf16 %v441_v9, %v440_v8  ;;  %v633_v26 = vld [vmem:[#allocation9 + $0x88] sm:$0xff]  ;;  %v638_v47 = vld [vmem:[#allocation9 + $0xb0] sm:$0xff]  ;;  %v639_v48 = vld [vmem:[#allocation9 + $0xb8] sm:$0xff] }
  0x63   :  { %1093 = vmatprep.subr.bf16.mxu1 %v1092_v58  ;;  %v1141_v58 = vpack.c.bf16 %v530_v57, %v529_v56  ;;  %v616_v29 = vld [vmem:[#allocation9 + $0x8] sm:$0xff]  ;;  %v623_v53 = vld [vmem:[#allocation9 + $0x40] sm:$0xff]  ;;  %v642_v57 = vld [vmem:[#allocation9 + $0xd0] sm:$0xff] }
  0x64   :  { %v620_v44 = vld [vmem:[#allocation9 + $0x28] sm:$0xff]  ;;  %v630_v8 = vld [vmem:[#allocation9 + $0x78] sm:$0xff] }
  0x65   :  { %v624_v54 = vld [vmem:[#allocation9 + $0x48] sm:$0xff] }
  0x66   :  { %1095 = vmatpush1.bf16.msra.mxu1 %v1094_v61  ;;  %v1144_v61 = vpack.c.bf16 %v532_v60, %v531_v59  ;;  %v1189_v56 = vpack.c.bf16 %v624_v54, %v623_v53  ;;  %v625_v59 = vld [vmem:[#allocation9 + $0x50] sm:$0xff]  ;;  %v626_v60 = vld [vmem:[#allocation9 + $0x58] sm:$0xff] }
  0x67   :  { %1097 = vmatprep.subr.bf16.mxu1 %v1096_v3  ;;  %v439_v3 = vld [vmem:[#allocation8 + $0x68] sm:$0xff] }
  0x68   :  { %v1123_v4 = vpack.c.bf16 %v439_v3, %v438_v2  ;;  %v645_v2 = vld [vmem:[#allocation9 + $0xe8] sm:$0xff]  ;;  %v627_v3 = vld [vmem:[#allocation9 + $0x60] sm:$0xff] }
  0x6a   :  { %1099 = vmatpush1.bf16.msra.mxu1 %v1098_v7  ;;  %v1147_v7 = vpack.c.bf16 %v534_v6, %v533_v5 }
  0x6b   :  { %1101 = vmatprep.subr.bf16.mxu1 %v1100_v12  ;;  %v536_v12 = vld [vmem:[#allocation8 + $0xf8] sm:$0xff] }
  0x6c   :  { %v1150_v13 = vpack.c.bf16 %v536_v12, %v535_v11  ;;  %v647_v11 = vld [vmem:[#allocation9 + $0xf8] sm:$0xff] }
  0x6e   :  { %1103 = vmatpush1.bf16.msra.mxu1 %v1102_v14  ;;  %v413_v14 = vshrl.u32 %v199_v19, 7 }
  0x6f   :  { %1128 = vmatprep.subr.bf16.mxu1 %v1345_v0 }
 0x130   :  { %v179_v16 = vpop.f32.mrb[0].mxu0 }
 0x131   :  { %v194_v17 = vadd.f32 %v815_v15, %v179_v16  ;;  %v919_v18 = vpop.f32.mrb[1].mxu0  ;;  %v426_v15 = vld [vmem:[#allocation8] sm:$0xff]  ;;  %v427_v16 = vld [vmem:[#allocation8 + $0x8] sm:$0xff] }
 0x132   :  { %v428_v18 = vld [vmem:[#allocation8 + $0x10] sm:$0xff] }
 0x133   :  { %195 = vadd.xlane.f32.xlu0 %v194_v17 }
 0x134   :  { %v334_v62 = vpop.f32.mrb[2].mxu0 }
 0x135   :  { %v336_v63 = vpop.f32.mrb[3].mxu0 }
 0x1c0   :  { %v196_v21 = vpop.xlane.xlu0 %195 }
 0x1c1   :  { %v197_v22 = vmul.f32 0.03125, %v196_v21  ;;  %v1108_v21 = vpack.c.bf16 %v429_v20, %v428_v18 }
 0x1c3   :  { %v1488_v23 = vsub.f32 %v194_v17, %v197_v22  ;;  %v1105_v17 = vpack.c.bf16 %v427_v16, %v426_v15  ;;  %v430_v22 = vld [vmem:[#allocation8 + $0x20] sm:$0xff]  ;;  %v414_v15 = vsub.s32 0, %v413_v14 }
 0x1c4   :  { %v410_v16 = vld [vmem:[%s1575_s6] sm:$0x3] }
 0x1c5   :  { %v202_v24 = vsel %vm201_vm2, %v1488_v23, 0.0  ;;  %1106 = vmatpush3.bf16.msra.mxu0 %v1105_v17  ;;  %v418_v17 = vsub.s32 1, %v413_v14  ;;  %v415_v18 = vrot.slane %v410_v16, %v414_v15  ;;  %v822_v14 = vld [vmem:[%s1577_s8 + $0x1] ss:$0 sm:$0xff] }
 0x1c6   :  { %v203_v25 = vmul.f32 %v202_v24, %v202_v24  ;;  %1107 = vmatprep.subr.bf16.mxu0 %v1345_v0  ;;  %v431_v24 = vld [vmem:[#allocation8 + $0x28] sm:$0xff] }
 0x1c8   :  { %204 = vadd.xlane.f32.xlu0 %v203_v25  ;;  %v1111_v25 = vpack.c.bf16 %v431_v24, %v430_v22 }
 0x1c9   :  { %1109 = vmatpush3.bf16.msra.mxu0 %v1108_v21  ;;  %v419_v21 = vrot.slane %v410_v16, %v418_v17 }
 0x1ca   :  { %1110 = vmatprep.subr.bf16.mxu0 %v1345_v0 }
 0x1cd   :  { %1112 = vmatpush3.bf16.msra.mxu0 %v1111_v25  ;;  %v632_v25 = vld [vmem:[#allocation9 + $0x80] sm:$0xff] }
 0x1ce   :  { %1113 = vmatprep.subr.bf16.mxu0 %v1345_v0  ;;  %v1153_v32 = vpack.c.bf16 %v633_v26, %v632_v25  ;;  %v823_v26 = vld [vmem:[%s1579_s10] ss:$0 sm:$0xff] }
 0x1d1   :  { %1115 = vmatpush3.bf16.msra.mxu0 %v1114_v28  ;;  %v615_v28 = vld [vmem:[#allocation9] sm:$0xff] }
 0x1d2   :  { %1116 = vmatprep.subr.bf16.mxu0 %v1345_v0  ;;  %v1177_v33 = vpack.c.bf16 %v616_v29, %v615_v28 }
 0x1d5   :  { %1118 = vmatpush3.bf16.msra.mxu0 %v1117_v31 }
 0x1d6   :  { %1119 = vmatprep.subr.bf16.mxu0 %v1345_v0 }
 0x1d9   :  { %1121 = vmatpush3.bf16.msra.mxu0 %v1120_v34  ;;  %v634_v34 = vld [vmem:[#allocation9 + $0x90] sm:$0xff] }
 0x1da   :  { %1122 = vmatprep.subr.bf16.mxu0 %v1345_v0 }
 0x1dd   :  { %1124 = vmatpush3.bf16.msra.mxu0 %v1123_v4  ;;  %v628_v4 = vld [vmem:[#allocation9 + $0x68] sm:$0xff] }
 0x1de   :  { %1125 = vmatprep.subr.bf16.mxu0 %v1345_v0  ;;  %v1195_v6 = vpack.c.bf16 %v628_v4, %v627_v3 }
 0x1e1   :  { %1127 = vmatpush3.bf16.msra.mxu0 %v1126_v10  ;;  %v646_v10 = vld [vmem:[#allocation9 + $0xf0] sm:$0xff] }
 0x1e2   :  { %1152 = vmatprep.subr.bf16.mxu0 %v1345_v0  ;;  %v1174_v12 = vpack.c.bf16 %v647_v11, %v646_v10 }
 0x255   :  { %v205_v35 = vpop.xlane.xlu0 %204 }
 0x256   :  { %v206_v36 = vmul.f32 0.03125, %v205_v35  ;;  %v635_v35 = vld [vmem:[#allocation9 + $0x98] sm:$0xff] }
 0x258   :  { %v207_v37 = vadd.f32 1e-05, %v206_v36 }
 0x25a   :  { %1215 = vrsqrt.f32 %v207_v37  ;;  %v617_v37 = vld [vmem:[#allocation9 + $0x10] sm:$0xff] }
 0x264   :  { %v1216_v38 = vpop.eup %1215 }
 0x265   :  { %v209_v40 = vmul.f32 %v1216_v38, %v1488_v23  ;;  %v525_v23 = vld [vmem:[#allocation8 + $0xa0] sm:$0xff]  ;;  %v618_v38 = vld [vmem:[#allocation9 + $0x18] sm:$0xff] }
 0x266   :  { %v1135_v52 = vpack.c.bf16 %v526_v51, %v525_v23  ;;  %v1162_v23 = vpack.c.bf16 %v639_v48, %v638_v47 }
 0x267   :  { %v215_v42 = vmul.f32 %v816_v39, %v209_v40  ;;  %v1156_v39 = vpack.c.bf16 %v635_v35, %v634_v34  ;;  %v1180_v40 = vpack.c.bf16 %v618_v38, %v617_v37 }
 0x269   :  { %v221_v43 = vadd.f32 %v817_v41, %v215_v42  ;;  %v636_v41 = vld [vmem:[#allocation9 + $0xa0] sm:$0xff]  ;;  %v637_v42 = vld [vmem:[#allocation9 + $0xa8] sm:$0xff] }
 0x26a   :  { %v1159_v45 = vpack.c.bf16 %v637_v42, %v636_v41 }
 0x26b   :  { %1217 = vtanh.f32 %v221_v43  ;;  %v619_v43 = vld [vmem:[#allocation9 + $0x20] sm:$0xff] }
 0x275   :  { %v1218_v49 = vpop.eup %1217 }
 0x276   :  { %404 = vmatmul.mubr.f32.vlgmr.msra.gmra.mrb[0].mxu1 %v1218_v49  ;;  %v621_v49 = vld [vmem:[#allocation9 + $0x30] sm:$0xff] }
 0x277   :  { %1130 = vmatpush3.bf16.msra.mxu1 %v1129_v46  ;;  %987 = vmatprep.mubr.msk.f32.mxu1 %vm1346_vm0, %v1347_v1  ;;  %v1183_v46 = vpack.c.bf16 %v620_v44, %v619_v43 }
 0x278   :  { %1131 = vmatprep.subr.bf16.mxu1 %v1345_v0 }
 0x27b   :  { %1133 = vmatpush3.bf16.msra.mxu1 %v1132_v50  ;;  %v622_v50 = vld [vmem:[#allocation9 + $0x38] sm:$0xff] }
 0x27c   :  { %1134 = vmatprep.subr.bf16.mxu1 %v1345_v0  ;;  %v1186_v51 = vpack.c.bf16 %v622_v50, %v621_v49 }
 0x27f   :  { %1136 = vmatpush3.bf16.msra.mxu1 %v1135_v52  ;;  %v640_v52 = vld [vmem:[#allocation9 + $0xc0] sm:$0xff] }
 0x280   :  { %1137 = vmatprep.subr.bf16.mxu1 %v1345_v0 }
 0x283   :  { %1139 = vmatpush3.bf16.msra.mxu1 %v1138_v55 }
 0x284   :  { %1140 = vmatprep.subr.bf16.mxu1 %v1345_v0 }
 0x287   :  { %1142 = vmatpush3.bf16.msra.mxu1 %v1141_v58  ;;  %v643_v58 = vld [vmem:[#allocation9 + $0xd8] sm:$0xff] }
 0x288   :  { %1143 = vmatprep.subr.bf16.mxu1 %v1345_v0 }
 0x28b   :  { %1145 = vmatpush3.bf16.msra.mxu1 %v1144_v61  ;;  %v1168_v61 = vpack.c.bf16 %v643_v58, %v642_v57 }
 0x28c   :  { %1146 = vmatprep.subr.bf16.mxu1 %v1345_v0 }
 0x28f   :  { %1148 = vmatpush3.bf16.msra.mxu1 %v1147_v7  ;;  %v629_v7 = vld [vmem:[#allocation9 + $0x70] sm:$0xff] }
 0x290   :  { %1149 = vmatprep.subr.bf16.mxu1 %v1345_v0  ;;  %v1198_v9 = vpack.c.bf16 %v630_v8, %v629_v7 }
 0x293   :  { %1151 = vmatpush3.bf16.msra.mxu1 %v1150_v13  ;;  %v821_v13 = vld [vmem:[%s1577_s8] ss:$0 sm:$0xff]  ;;  %s1307_s8 = scalar_lea.vmem %s804_s23, 128 }
 0x294   :  { %1176 = vmatprep.subr.bf16.mxu1 %v1345_v0  ;;  %p1308_p4 = scmp.ne.s32.totalorder %s804_s23, %s1307_s8  ;;  %p1313_p6 = scmp.lt.s32.totalorder %s1307_s8, %s1307_s8 }
 0x296   :  { %p1314_p7 = por %p1313_p6, %p1312_p5 }
 0x298   :  { %p1315_p8 = pnand %p1314_p7, %p1308_p4 }
 0x349   :  { %v405_v20 = vpop.f32.mrb[0].mxu1 }
 0x34a   :  { %v406_v22 = vadd.f32 %v405_v20, %v334_v62  ;;  %v407_v24 = vpop.f32.mrb[1].mxu1  ;;  %v1192_v62 = vpack.c.bf16 %v626_v60, %v625_v59 }
 0x34b   :  { %v408_v27 = vadd.f32 %v407_v24, %v336_v63  ;;  %v644_v63 = vld [vmem:[#allocation9 + $0xe0] sm:$0xff] }
 0x34c   :  { %v422_v30 = vadd.f32 %v415_v18, %v406_v22  ;;  %v1171_v5 = vpack.c.bf16 %v645_v2, %v644_v63 }
 0x34d   :  { %v423_v31 = vadd.f32 %v419_v21, %v408_v27 }
 0x34e   :  { %v424_v19 = vmax.f32 %v422_v30, 0.0 }
 0x34f   :  { %v425_v36 = vmax.f32 %v423_v31, 0.0 }
 0x350   :  { %953 = vmatmul.mubr.f32.vlgmr.msra.gmra.mrb[4].mxu0 %v424_v19 }
 0x351   :  { %988 = vmatmul.mubr.f32.vlgmr.msra.gmra.mrb[2].mxu1 %v425_v36  ;;  %1154 = vmatpush3.bf16.msra.mxu0 %v1153_v32 }
 0x352   :  { %1178 = vmatpush3.bf16.msra.mxu1 %v1177_v33  ;;  %1155 = vmatprep.subr.bf16.mxu0 %v1345_v0 }
 0x353   :  { %1179 = vmatprep.subr.bf16.mxu1 %v1345_v0  ;;  %1057 = vmatprep.mubr.msk.f32.mxu1 %vm1346_vm0, %v1347_v1 }
 0x354   :  { %1022 = vmatprep.mubr.msk.f32.mxu0 %vm1346_vm0, %v1347_v1  ;;  %v641_v1 = vld [vmem:[#allocation9 + $0xc8] sm:$0xff] }
 0x355   :  { %1157 = vmatpush3.bf16.msra.mxu0 %v1156_v39  ;;  %v1165_v55 = vpack.c.bf16 %v641_v1, %v640_v52 }
 0x356   :  { %1181 = vmatpush3.bf16.msra.mxu1 %v1180_v40  ;;  %1158 = vmatprep.subr.bf16.mxu0 %v1345_v0 }
 0x357   :  { %1182 = vmatprep.subr.bf16.mxu1 %v1345_v0 }
 0x359   :  { %1160 = vmatpush3.bf16.msra.mxu0 %v1159_v45 }
 0x35a   :  { %1184 = vmatpush3.bf16.msra.mxu1 %v1183_v46  ;;  %1161 = vmatprep.subr.bf16.mxu0 %v1345_v0 }
 0x35b   :  { %1185 = vmatprep.subr.bf16.mxu1 %v1345_v0 }
 0x35d   :  { %1163 = vmatpush3.bf16.msra.mxu0 %v1162_v23 }
 0x35e   :  { %1187 = vmatpush3.bf16.msra.mxu1 %v1186_v51  ;;  %1164 = vmatprep.subr.bf16.mxu0 %v1345_v0 }
 0x35f   :  { %1188 = vmatprep.subr.bf16.mxu1 %v1345_v0 }
 0x361   :  { %1166 = vmatpush3.bf16.msra.mxu0 %v1165_v55 }
 0x362   :  { %1190 = vmatpush3.bf16.msra.mxu1 %v1189_v56  ;;  %1167 = vmatprep.subr.bf16.mxu0 %v1345_v0 }
 0x363   :  { %1191 = vmatprep.subr.bf16.mxu1 %v1345_v0 }
 0x365   :  { %1169 = vmatpush3.bf16.msra.mxu0 %v1168_v61 }
 0x366   :  { %1193 = vmatpush3.bf16.msra.mxu1 %v1192_v62  ;;  %1170 = vmatprep.subr.bf16.mxu0 %v1345_v0 }
 0x367   :  { %1194 = vmatprep.subr.bf16.mxu1 %v1345_v0 }
 0x369   :  { %1172 = vmatpush3.bf16.msra.mxu0 %v1171_v5 }
 0x36a   :  { %1196 = vmatpush3.bf16.msra.mxu1 %v1195_v6  ;;  %1173 = vmatprep.subr.bf16.mxu0 %v1345_v0 }
 0x36b   :  { %1197 = vmatprep.subr.bf16.mxu1 %v1345_v0 }
 0x36d   :  { %1175 = vmatpush3.bf16.msra.mxu0 %v1174_v12 }
 0x36e   :  { %1199 = vmatpush3.bf16.msra.mxu1 %v1198_v9 }
 0x423   :  { %v515_v15 = vpop.f32.mrb[4].mxu0 }
 0x424   :  { %v516_v16 = vadd.f32 %v821_v13, %v515_v15  ;;  %v954_v17 = vpop.f32.mrb[5].mxu0  ;;  %v610_v0 = vpop.f32.mrb[2].mxu1 }
 0x425   :  { %v611_v18 = vadd.f32 %v822_v14, %v610_v0  ;;  %v989_v20 = vpop.f32.mrb[3].mxu1 }
 0x426   :  { %v519_v21 = vmax.f32 %v516_v16, 0.0 }
 0x427   :  { %v614_v22 = vmax.f32 %v611_v18, 0.0 }
 0x428   :  { %1058 = vmatmul.mubr.f32.vlgmr.msra.gmra.mrb[4].mxu1 %v519_v21 }
 0x429   :  { %1023 = vmatmul.mubr.f32.vlgmr.msra.gmra.mrb[6].mxu0 %v614_v22 }
 0x4fb   :  { %v784_v24 = vpop.f32.mrb[4].mxu1 }
 0x4fc   :  { %v714_v25 = vpop.f32.mrb[6].mxu0  ;;  %v1059_v27 = vpop.f32.mrb[5].mxu1 }
 0x4fd   :  { %v785_v28 = vadd.f32 %v784_v24, %v714_v25  ;;  %v1024_v29 = vpop.f32.mrb[7].mxu0 }
 0x4ff   :  { %v795_v30 = vadd.f32 %v823_v26, %v785_v28 }
 0x501   :  { %796 = vst [vmem:[#allocation11] sm:$0xff] %v795_v30 }
 0x502   :  { %1318 = shalt.err (!%p1315_p8)
}
 0x503   :  { %s1319_s27 = scalar_lea.hbm %s1580_s11, 128 }
 0x504   :  { %p1320_p9 = scmp.ne.s32.totalorder %s1580_s11, %s1319_s27  ;;  %p1323_p10 = scmp.lt.u32.totalorder %s1319_s27, %s1580_s11 }
 0x506   :  { %p1325_p11 = pnand %p1323_p10, %p1320_p9 }
 0x508   :  { %1328 = shalt.err (!%p1325_p11)
}
 0x509   :  { %806 = dma.vmem_to_hbm [thread:$0]  %s804_s23, 128, %s1580_s11, [#allocation5]  }
 0x50a   :  { %1335 = dma.done.wait [#allocation5], 128  }
 0x50b   :  { %1336 = vsyncadd [#allocation5], 4294967168 }
 0x50c   :  { %810 = vsyncpa [#allocation4], 1 }
 0x50d   :  { %811 = vsyncpa [#allocation7], 1 }
 0x50e   :  { %812 = vsyncpa [#allocation10], 1 }
 0x50f   :  { %813 = vsyncpa [#allocation5], 1 }

</bundles_post_ra>
